<compile_context>
chip_gen: v7x
topology: tpu7x:2x2x1
jax: 0.10.0
libtpu: 0.0.40
codegen_flags: <defaults>
</compile_context>

<pallas_src>
import functools

import jax
import jax.numpy as jnp
from jax.experimental import pallas as pl
from jax.experimental.pallas import tpu as pltpu

LANE = 128
SUBLANE = 8
NEG_SLOPE = 0.2


def _round_up(x, m):
    return (x + m - 1) // m * m


# ---------------------------------------------------------------------------
# Pallas kernels: fused GEMM (+ bias + LeakyReLU)
# ---------------------------------------------------------------------------
def _gemm_bias_act_kernel(x_ref, w_ref, b_ref, o_ref, *, negative_slope):
    acc = jnp.dot(x_ref[...], w_ref[...], preferred_element_type=jnp.float32)
    acc = acc + b_ref[...]
    acc = jnp.where(acc >= 0.0, acc, negative_slope * acc)
    o_ref[...] = acc.astype(o_ref.dtype)


def _gemm_kernel(x_ref, w_ref, o_ref):
    acc = jnp.dot(x_ref[...], w_ref[...], preferred_element_type=jnp.float32)
    o_ref[...] = acc.astype(o_ref.dtype)


_COMPILER_PARAMS = pltpu.CompilerParams(
    dimension_semantics=("parallel",),      # shard M tiles across TCs (v7x)
    vmem_limit_bytes=32 * 1024 * 1024,      # safe on v5e/v6e/v7x; tiles << this
)


def fused_gemm(x, w, b=None, *, apply_act, out_dtype,
               negative_slope=NEG_SLOPE, tile_m=512):
    """x: (M, K) bf16, w: (K, N=128k) bf16, b: (1, N) f32 or None -> (M, N)."""
    M, K = x.shape
    Kw, N = w.shape
    assert K == Kw and N % LANE == 0

    tm = min(tile_m, _round_up(M, SUBLANE))
    m_pad = _round_up(M, tm)
    if m_pad != M:
        x = jnp.pad(x, ((0, m_pad - M), (0, 0)))
    grid = (m_pad // tm,)

    x_spec = pl.BlockSpec((tm, K), lambda i: (i, 0))
    w_spec = pl.BlockSpec((K, N), lambda i: (0, 0))     # resident across steps
    o_spec = pl.BlockSpec((tm, N), lambda i: (i, 0))
    out_shape = jax.ShapeDtypeStruct((m_pad, N), out_dtype)

    if b is not None:
        assert apply_act
        out = pl.pallas_call(
            functools.partial(_gemm_bias_act_kernel,
                              negative_slope=negative_slope),
            out_shape=out_shape,
            grid=grid,
            in_specs=[x_spec, w_spec, pl.BlockSpec((1, N), lambda i: (0, 0))],
            out_specs=o_spec,
            compiler_params=_COMPILER_PARAMS,
        )(x, w, b)
    else:
        assert not apply_act
        out = pl.pallas_call(
            _gemm_kernel,
            out_shape=out_shape,
            grid=grid,
            in_specs=[x_spec, w_spec],
            out_specs=o_spec,
            compiler_params=_COMPILER_PARAMS,
        )(x, w)
    return out[:M] if m_pad != M else out


# ---------------------------------------------------------------------------
# im2col (plain-JAX glue, fused by XLA under jit)
# ---------------------------------------------------------------------------
def _im2col_nhwc(x, kh, kw, stride, pad):
    B, H, W, C = x.shape
    xp = jnp.pad(x, ((0, 0), (pad, pad), (pad, pad), (0, 0)))
    Ho = (H + 2 * pad - kh) // stride + 1
    Wo = (W + 2 * pad - kw) // stride + 1
    cols = []
    for i in range(kh):
        for j in range(kw):
            cols.append(xp[:, i:i + stride * Ho:stride,
                           j:j + stride * Wo:stride, :])   # (B, Ho, Wo, C)
    col = jnp.stack(cols, axis=3)                           # (B, Ho, Wo, kh*kw, C)
    return col.reshape(B * Ho * Wo, kh * kw * C), Ho, Wo


# ---------------------------------------------------------------------------
# Parameters: raw (f32, PyTorch shapes) + packed (bf16, lane-padded GEMM form)
# ---------------------------------------------------------------------------
def init_raw_params(key, in_channels, out_dim, width):
    """Synthetic parameters following the module's __init__ (in_size != 64)."""
    layer_defs = [
        (in_channels, width, 3, 1, 1),       # first conv (32x32 branch)
        (width, width * 2, 4, 2, 1),
        (width * 2, width * 4, 4, 2, 1),
        (width * 4, width * 8, 4, 2, 1),
    ]
    convs = []
    for (cin, cout, k, s, p) in layer_defs:
        key, k_w, k_b = jax.random.split(key, 3)
        scale = 1.0 / jnp.sqrt(cin * k * k)
        w = scale * jax.random.normal(k_w, (cout, cin, k, k), jnp.float32)
        b = 0.1 * jax.random.normal(k_b, (cout,), jnp.float32)
        convs.append((w, b, s, p))
    key, k_last = jax.random.split(key)
    scale = 1.0 / jnp.sqrt(width * 8 * 4 * 4)
    last_w = scale * jax.random.normal(k_last, (out_dim, width * 8, 4, 4),
                                       jnp.float32)
    return {"conv": convs, "last_w": last_w}


def pack_params(raw):
    """Precompute lane-padded bf16 GEMM weights & f32 biases once (off the fwd path)."""
    geoms, couts, wmats, biases = [], [], [], []
    for (w, b, s, p) in raw["conv"]:
        cout, cin, kh, kw_sz = w.shape
        n_pad = _round_up(cout, LANE)
        # (Cout, Cin, kh, kw) -> (kh, kw, Cin, Cout) -> (kh*kw*Cin, Cout):
        # matches the (i, j, ci) ordering produced by _im2col_nhwc.
        wm = jnp.transpose(w, (2, 3, 1, 0)).reshape(kh * kw_sz * cin, cout)
        wmats.append(jnp.pad(wm, ((0, 0), (0, n_pad - cout))).astype(jnp.bfloat16))
        biases.append(jnp.pad(b, (0, n_pad - cout))
                      .reshape(1, n_pad).astype(jnp.float32))
        geoms.append((kh, s, p))
        couts.append(cout)

    lw = raw["last_w"]
    cout, cin, kh, kw_sz = lw.shape
    n_pad = _round_up(cout, LANE)
    lwm = jnp.transpose(lw, (2, 3, 1, 0)).reshape(kh * kw_sz * cin, cout)
    last_wmat = jnp.pad(lwm, ((0, 0), (0, n_pad - cout))).astype(jnp.bfloat16)

    static = dict(geoms=tuple(geoms), couts=tuple(couts), out_dim=int(cout))
    arrays = dict(wmats=tuple(wmats), biases=tuple(biases), last_wmat=last_wmat)
    return static, arrays


# ---------------------------------------------------------------------------
# Forward pass (jitted; static geometry captured by closure)
# ---------------------------------------------------------------------------
def build_forward(static):
    geoms, couts, out_dim = static["geoms"], static["couts"], static["out_dim"]

    def forward(arrays, x_nchw):
        # TODO(synk): additional-input conditioning path (c_mlp + modulation),
        # batch_norm and spectral_norm are Identity/no-op in this configuration.
        h = jnp.transpose(x_nchw, (0, 2, 3, 1)).astype(jnp.bfloat16)  # NCHW->NHWC
        B = h.shape[0]
        for (k, s, p), cout, wmat, bias in zip(geoms, couts,
                                               arrays["wmats"], arrays["biases"]):
            col, Ho, Wo = _im2col_nhwc(h, k, k, s, p)
            out = fused_gemm(col, wmat, bias, apply_act=True,
                             out_dtype=jnp.bfloat16)
            # keep only the true output channels for the next layer's im2col
            h = out.reshape(B, Ho, Wo, -1)[..., :cout]
        # last_conv: Conv2d(width*8, out_dim, 4, 1, 0, bias=False) + Flatten.
        # On a 4x4 map this is a single GEMM over the flattened (h, w, c) window.
        flat = h.reshape(B, -1)
        out = fused_gemm(flat, arrays["last_wmat"], None,
                         apply_act=False, out_dtype=jnp.float32)
        return out[:, :out_dim]

    return jax.jit(forward)


# ---------------------------------------------------------------------------
# Pure-JAX f32 reference (lax.conv) for the correctness check
# ---------------------------------------------------------------------------
def dcgan_encoder_reference(raw, x_nchw):
    def conv(x, w, b, s, p):
        y = jax.lax.conv_general_dilated(
            x, w, (s, s), ((p, p), (p, p)),
            dimension_numbers=("NCHW", "OIHW", "NCHW"))
        if b is not None:
            y = y + b[None, :, None, None]
        return y

    h = x_nchw
    for (w, b, s, p) in raw["conv"]:
        h = conv(h, w, b, s, p)
        h = jnp.where(h >= 0.0, h, NEG_SLOPE * h)
    h = conv(h, raw["last_w"], None, 1, 0)
    return h.reshape(h.shape[0], -1)


if __name__ == "__main__":
    B, Cin, S = 2, 3, 32          # small input: batch=2, channels=3, 32x32
    width, out_dim = 8, 16

    key = jax.random.PRNGKey(0)
    kx, kp = jax.random.split(key)
    x = jax.random.normal(kx, (B, Cin, S, S), jnp.float32)

    raw = init_raw_params(kp, Cin, out_dim, width)
    static, arrays = pack_params(raw)
    forward = build_forward(static)

    out = jax.block_until_ready(forward(arrays, x))
    assert out.shape == (B, out_dim), out.shape

    ref = jax.block_until_ready(dcgan_encoder_reference(raw, x))
    max_err = float(jnp.max(jnp.abs(out - ref)))
    # bf16 GEMM operands with f32 accumulation vs. pure-f32 reference.
    assert max_err < 1e-1, f"mismatch vs reference: {max_err}"

    print("KERNEL_OK")
</pallas_src>

<mosaic_0001>
module attributes {stable_mosaic.version = 11 : i64} {
  func.func @_gemm_bias_act_kernel(%arg0: i32, %arg1: memref<512x27xbf16, #tpu.memory_space<vmem>>, %arg2: memref<27x128xbf16, #tpu.memory_space<vmem>>, %arg3: memref<1x128xf32, #tpu.memory_space<vmem>>, %arg4: memref<512x128xbf16, #tpu.memory_space<vmem>>) attributes {dimension_semantics = [#tpu.dimension_semantics<parallel>], iteration_bounds = array<i64: 4>, scalar_prefetch = 0 : i64, scratch_operands = 0 : i64, tpu.core_type = #tpu.core_type<tc>, window_params = [{transform_indices = @transform_0, window_bounds = array<i64: 512, 27>}, {pipeline_mode = #tpu.pipeline_mode<synchronous>, transform_indices = @transform_1, window_bounds = array<i64: 27, 128>}, {pipeline_mode = #tpu.pipeline_mode<synchronous>, transform_indices = @transform_2, window_bounds = array<i64: 1, 128>}, {transform_indices = @transform_3, window_bounds = array<i64: 512, 128>}]} {
    %c0 = arith.constant 0 : index
    %c0_0 = arith.constant 0 : index
    %0 = vector.load %arg1[%c0, %c0_0] : memref<512x27xbf16, #tpu.memory_space<vmem>>, vector<512x27xbf16>
    %c0_1 = arith.constant 0 : index
    %c0_2 = arith.constant 0 : index
    %1 = vector.load %arg2[%c0_1, %c0_2] : memref<27x128xbf16, #tpu.memory_space<vmem>>, vector<27x128xbf16>
    %cst = arith.constant dense<0.000000e+00> : vector<512x128xf32>
    %2 = tpu.matmul %0, %1, %cst {dimension_numbers = #tpu.dot_dimension_numbers<[1], [0], [0], [1], [0, 0, 1, 1], [], []>} : vector<512x27xbf16>, vector<27x128xbf16>, vector<512x128xf32> -> vector<512x128xf32>
    %c0_3 = arith.constant 0 : index
    %c0_4 = arith.constant 0 : index
    %3 = vector.load %arg3[%c0_3, %c0_4] : memref<1x128xf32, #tpu.memory_space<vmem>>, vector<1x128xf32>
    %4 = vector.broadcast %3 : vector<1x128xf32> to vector<512x128xf32>
    %5 = arith.addf %2, %4 : vector<512x128xf32>
    %cst_5 = arith.constant 0.000000e+00 : f32
    %6 = vector.broadcast %cst_5 : f32 to vector<512x128xf32>
    %7 = arith.cmpf oge, %5, %6 : vector<512x128xf32>
    %cst_6 = arith.constant 2.000000e-01 : f32
    %8 = vector.broadcast %cst_6 : f32 to vector<512x128xf32>
    %9 = arith.mulf %8, %5 : vector<512x128xf32>
    %10 = arith.select %7, %5, %9 : vector<512x128xi1>, vector<512x128xf32>
    %11 = arith.truncf %10 : vector<512x128xf32> to vector<512x128xbf16>
    %c0_7 = arith.constant 0 : index
    %c0_8 = arith.constant 0 : index
    %12 = vector.load %arg4[%c0_7, %c0_8] : memref<512x128xbf16, #tpu.memory_space<vmem>>, vector<512x128xbf16>
    tpu.vector_store %arg4[%c0_7, %c0_8], %11 {strides = array<i32>} : memref<512x128xbf16, #tpu.memory_space<vmem>>, vector<512x128xbf16>,
    return
  }
  func.func @transform_0(%arg0: i32) -> (i32, i32) {
    %c0_i32 = arith.constant 0 : i32
    %c0_i32_0 = arith.constant 0 : i32
    return %arg0, %c0_i32 : i32, i32
  }
  func.func @transform_1(%arg0: i32) -> (i32, i32) {
    %c0_i32 = arith.constant 0 : i32
    %c0_i32_0 = arith.constant 0 : i32
    %c0_i32_1 = arith.constant 0 : i32
    return %c0_i32, %c0_i32_0 : i32, i32
  }
  func.func @transform_2(%arg0: i32) -> (i32, i32) {
    %c0_i32 = arith.constant 0 : i32
    %c0_i32_0 = arith.constant 0 : i32
    %c0_i32_1 = arith.constant 0 : i32
    return %c0_i32, %c0_i32_0 : i32, i32
  }
  func.func @transform_3(%arg0: i32) -> (i32, i32) {
    %c0_i32 = arith.constant 0 : i32
    %c0_i32_0 = arith.constant 0 : i32
    return %arg0, %c0_i32 : i32, i32
  }
}

module attributes {stable_mosaic.version = 11 : i64} {
  func.func @_gemm_bias_act_kernel(%arg0: i32, %arg1: memref<512x128xbf16, #tpu.memory_space<vmem>>, %arg2: memref<128x128xbf16, #tpu.memory_space<vmem>>, %arg3: memref<1x128xf32, #tpu.memory_space<vmem>>, %arg4: memref<512x128xbf16, #tpu.memory_space<vmem>>) attributes {dimension_semantics = [#tpu.dimension_semantics<parallel>], iteration_bounds = array<i64: 1>, scalar_prefetch = 0 : i64, scratch_operands = 0 : i64, tpu.core_type = #tpu.core_type<tc>, window_params = [{transform_indices = @transform_0, window_bounds = array<i64: 512, 128>}, {pipeline_mode = #tpu.pipeline_mode<synchronous>, transform_indices = @transform_1, window_bounds = array<i64: 128, 128>}, {pipeline_mode = #tpu.pipeline_mode<synchronous>, transform_indices = @transform_2, window_bounds = array<i64: 1, 128>}, {transform_indices = @transform_3, window_bounds = array<i64: 512, 128>}]} {
    %c0 = arith.constant 0 : index
    %c0_0 = arith.constant 0 : index
    %0 = vector.load %arg1[%c0, %c0_0] : memref<512x128xbf16, #tpu.memory_space<vmem>>, vector<512x128xbf16>
    %c0_1 = arith.constant 0 : index
    %c0_2 = arith.constant 0 : index
    %1 = vector.load %arg2[%c0_1, %c0_2] : memref<128x128xbf16, #tpu.memory_space<vmem>>, vector<128x128xbf16>
    %cst = arith.constant dense<0.000000e+00> : vector<512x128xf32>
    %2 = tpu.matmul %0, %1, %cst {dimension_numbers = #tpu.dot_dimension_numbers<[1], [0], [0], [1], [0, 0, 1, 1], [], []>} : vector<512x128xbf16>, vector<128x128xbf16>, vector<512x128xf32> -> vector<512x128xf32>
    %c0_3 = arith.constant 0 : index
    %c0_4 = arith.constant 0 : index
    %3 = vector.load %arg3[%c0_3, %c0_4] : memref<1x128xf32, #tpu.memory_space<vmem>>, vector<1x128xf32>
    %4 = vector.broadcast %3 : vector<1x128xf32> to vector<512x128xf32>
    %5 = arith.addf %2, %4 : vector<512x128xf32>
    %cst_5 = arith.constant 0.000000e+00 : f32
    %6 = vector.broadcast %cst_5 : f32 to vector<512x128xf32>
    %7 = arith.cmpf oge, %5, %6 : vector<512x128xf32>
    %cst_6 = arith.constant 2.000000e-01 : f32
    %8 = vector.broadcast %cst_6 : f32 to vector<512x128xf32>
    %9 = arith.mulf %8, %5 : vector<512x128xf32>
    %10 = arith.select %7, %5, %9 : vector<512x128xi1>, vector<512x128xf32>
    %11 = arith.truncf %10 : vector<512x128xf32> to vector<512x128xbf16>
    %c0_7 = arith.constant 0 : index
    %c0_8 = arith.constant 0 : index
    %12 = vector.load %arg4[%c0_7, %c0_8] : memref<512x128xbf16, #tpu.memory_space<vmem>>, vector<512x128xbf16>
    tpu.vector_store %arg4[%c0_7, %c0_8], %11 {strides = array<i32>} : memref<512x128xbf16, #tpu.memory_space<vmem>>, vector<512x128xbf16>,
    return
  }
  func.func @transform_0(%arg0: i32) -> (i32, i32) {
    %c0_i32 = arith.constant 0 : i32
    %c0_i32_0 = arith.constant 0 : i32
    return %arg0, %c0_i32 : i32, i32
  }
  func.func @transform_1(%arg0: i32) -> (i32, i32) {
    %c0_i32 = arith.constant 0 : i32
    %c0_i32_0 = arith.constant 0 : i32
    %c0_i32_1 = arith.constant 0 : i32
    return %c0_i32, %c0_i32_0 : i32, i32
  }
  func.func @transform_2(%arg0: i32) -> (i32, i32) {
    %c0_i32 = arith.constant 0 : i32
    %c0_i32_0 = arith.constant 0 : i32
    %c0_i32_1 = arith.constant 0 : i32
    return %c0_i32, %c0_i32_0 : i32, i32
  }
  func.func @transform_3(%arg0: i32) -> (i32, i32) {
    %c0_i32 = arith.constant 0 : i32
    %c0_i32_0 = arith.constant 0 : i32
    return %arg0, %c0_i32 : i32, i32
  }
}

module attributes {stable_mosaic.version = 11 : i64} {
  func.func @_gemm_bias_act_kernel(%arg0: i32, %arg1: memref<128x256xbf16, #tpu.memory_space<vmem>>, %arg2: memref<256x128xbf16, #tpu.memory_space<vmem>>, %arg3: memref<1x128xf32, #tpu.memory_space<vmem>>, %arg4: memref<128x128xbf16, #tpu.memory_space<vmem>>) attributes {dimension_semantics = [#tpu.dimension_semantics<parallel>], iteration_bounds = array<i64: 1>, scalar_prefetch = 0 : i64, scratch_operands = 0 : i64, tpu.core_type = #tpu.core_type<tc>, window_params = [{transform_indices = @transform_0, window_bounds = array<i64: 128, 256>}, {pipeline_mode = #tpu.pipeline_mode<synchronous>, transform_indices = @transform_1, window_bounds = array<i64: 256, 128>}, {pipeline_mode = #tpu.pipeline_mode<synchronous>, transform_indices = @transform_2, window_bounds = array<i64: 1, 128>}, {transform_indices = @transform_3, window_bounds = array<i64: 128, 128>}]} {
    %c0 = arith.constant 0 : index
    %c0_0 = arith.constant 0 : index
    %0 = vector.load %arg1[%c0, %c0_0] : memref<128x256xbf16, #tpu.memory_space<vmem>>, vector<128x256xbf16>
    %c0_1 = arith.constant 0 : index
    %c0_2 = arith.constant 0 : index
    %1 = vector.load %arg2[%c0_1, %c0_2] : memref<256x128xbf16, #tpu.memory_space<vmem>>, vector<256x128xbf16>
    %cst = arith.constant dense<0.000000e+00> : vector<128x128xf32>
    %2 = tpu.matmul %0, %1, %cst {dimension_numbers = #tpu.dot_dimension_numbers<[1], [0], [0], [1], [0, 0, 1, 1], [], []>} : vector<128x256xbf16>, vector<256x128xbf16>, vector<128x128xf32> -> vector<128x128xf32>
    %c0_3 = arith.constant 0 : index
    %c0_4 = arith.constant 0 : index
    %3 = vector.load %arg3[%c0_3, %c0_4] : memref<1x128xf32, #tpu.memory_space<vmem>>, vector<1x128xf32>
    %4 = vector.broadcast %3 : vector<1x128xf32> to vector<128x128xf32>
    %5 = arith.addf %2, %4 : vector<128x128xf32>
    %cst_5 = arith.constant 0.000000e+00 : f32
    %6 = vector.broadcast %cst_5 : f32 to vector<128x128xf32>
    %7 = arith.cmpf oge, %5, %6 : vector<128x128xf32>
    %cst_6 = arith.constant 2.000000e-01 : f32
    %8 = vector.broadcast %cst_6 : f32 to vector<128x128xf32>
    %9 = arith.mulf %8, %5 : vector<128x128xf32>
    %10 = arith.select %7, %5, %9 : vector<128x128xi1>, vector<128x128xf32>
    %11 = arith.truncf %10 : vector<128x128xf32> to vector<128x128xbf16>
    %c0_7 = arith.constant 0 : index
    %c0_8 = arith.constant 0 : index
    %12 = vector.load %arg4[%c0_7, %c0_8] : memref<128x128xbf16, #tpu.memory_space<vmem>>, vector<128x128xbf16>
    tpu.vector_store %arg4[%c0_7, %c0_8], %11 {strides = array<i32>} : memref<128x128xbf16, #tpu.memory_space<vmem>>, vector<128x128xbf16>,
    return
  }
  func.func @transform_0(%arg0: i32) -> (i32, i32) {
    %c0_i32 = arith.constant 0 : i32
    %c0_i32_0 = arith.constant 0 : i32
    return %arg0, %c0_i32 : i32, i32
  }
  func.func @transform_1(%arg0: i32) -> (i32, i32) {
    %c0_i32 = arith.constant 0 : i32
    %c0_i32_0 = arith.constant 0 : i32
    %c0_i32_1 = arith.constant 0 : i32
    return %c0_i32, %c0_i32_0 : i32, i32
  }
  func.func @transform_2(%arg0: i32) -> (i32, i32) {
    %c0_i32 = arith.constant 0 : i32
    %c0_i32_0 = arith.constant 0 : i32
    %c0_i32_1 = arith.constant 0 : i32
    return %c0_i32, %c0_i32_0 : i32, i32
  }
  func.func @transform_3(%arg0: i32) -> (i32, i32) {
    %c0_i32 = arith.constant 0 : i32
    %c0_i32_0 = arith.constant 0 : i32
    return %arg0, %c0_i32 : i32, i32
  }
}

module attributes {stable_mosaic.version = 11 : i64} {
  func.func @_gemm_bias_act_kernel(%arg0: i32, %arg1: memref<32x512xbf16, #tpu.memory_space<vmem>>, %arg2: memref<512x128xbf16, #tpu.memory_space<vmem>>, %arg3: memref<1x128xf32, #tpu.memory_space<vmem>>, %arg4: memref<32x128xbf16, #tpu.memory_space<vmem>>) attributes {dimension_semantics = [#tpu.dimension_semantics<parallel>], iteration_bounds = array<i64: 1>, scalar_prefetch = 0 : i64, scratch_operands = 0 : i64, tpu.core_type = #tpu.core_type<tc>, window_params = [{transform_indices = @transform_0, window_bounds = array<i64: 32, 512>}, {pipeline_mode = #tpu.pipeline_mode<synchronous>, transform_indices = @transform_1, window_bounds = array<i64: 512, 128>}, {pipeline_mode = #tpu.pipeline_mode<synchronous>, transform_indices = @transform_2, window_bounds = array<i64: 1, 128>}, {transform_indices = @transform_3, window_bounds = array<i64: 32, 128>}]} {
    %c0 = arith.constant 0 : index
    %c0_0 = arith.constant 0 : index
    %0 = vector.load %arg1[%c0, %c0_0] : memref<32x512xbf16, #tpu.memory_space<vmem>>, vector<32x512xbf16>
    %c0_1 = arith.constant 0 : index
    %c0_2 = arith.constant 0 : index
    %1 = vector.load %arg2[%c0_1, %c0_2] : memref<512x128xbf16, #tpu.memory_space<vmem>>, vector<512x128xbf16>
    %cst = arith.constant dense<0.000000e+00> : vector<32x128xf32>
    %2 = tpu.matmul %0, %1, %cst {dimension_numbers = #tpu.dot_dimension_numbers<[1], [0], [0], [1], [0, 0, 1, 1], [], []>} : vector<32x512xbf16>, vector<512x128xbf16>, vector<32x128xf32> -> vector<32x128xf32>
    %c0_3 = arith.constant 0 : index
    %c0_4 = arith.constant 0 : index
    %3 = vector.load %arg3[%c0_3, %c0_4] : memref<1x128xf32, #tpu.memory_space<vmem>>, vector<1x128xf32>
    %4 = vector.broadcast %3 : vector<1x128xf32> to vector<32x128xf32>
    %5 = arith.addf %2, %4 : vector<32x128xf32>
    %cst_5 = arith.constant 0.000000e+00 : f32
    %6 = vector.broadcast %cst_5 : f32 to vector<32x128xf32>
    %7 = arith.cmpf oge, %5, %6 : vector<32x128xf32>
    %cst_6 = arith.constant 2.000000e-01 : f32
    %8 = vector.broadcast %cst_6 : f32 to vector<32x128xf32>
    %9 = arith.mulf %8, %5 : vector<32x128xf32>
    %10 = arith.select %7, %5, %9 : vector<32x128xi1>, vector<32x128xf32>
    %11 = arith.truncf %10 : vector<32x128xf32> to vector<32x128xbf16>
    %c0_7 = arith.constant 0 : index
    %c0_8 = arith.constant 0 : index
    %12 = vector.load %arg4[%c0_7, %c0_8] : memref<32x128xbf16, #tpu.memory_space<vmem>>, vector<32x128xbf16>
    tpu.vector_store %arg4[%c0_7, %c0_8], %11 {strides = array<i32>} : memref<32x128xbf16, #tpu.memory_space<vmem>>, vector<32x128xbf16>,
    return
  }
  func.func @transform_0(%arg0: i32) -> (i32, i32) {
    %c0_i32 = arith.constant 0 : i32
    %c0_i32_0 = arith.constant 0 : i32
    return %arg0, %c0_i32 : i32, i32
  }
  func.func @transform_1(%arg0: i32) -> (i32, i32) {
    %c0_i32 = arith.constant 0 : i32
    %c0_i32_0 = arith.constant 0 : i32
    %c0_i32_1 = arith.constant 0 : i32
    return %c0_i32, %c0_i32_0 : i32, i32
  }
  func.func @transform_2(%arg0: i32) -> (i32, i32) {
    %c0_i32 = arith.constant 0 : i32
    %c0_i32_0 = arith.constant 0 : i32
    %c0_i32_1 = arith.constant 0 : i32
    return %c0_i32, %c0_i32_0 : i32, i32
  }
  func.func @transform_3(%arg0: i32) -> (i32, i32) {
    %c0_i32 = arith.constant 0 : i32
    %c0_i32_0 = arith.constant 0 : i32
    return %arg0, %c0_i32 : i32, i32
  }
}

module attributes {stable_mosaic.version = 11 : i64} {
  func.func @_gemm_kernel(%arg0: i32, %arg1: memref<8x1024xbf16, #tpu.memory_space<vmem>>, %arg2: memref<1024x128xbf16, #tpu.memory_space<vmem>>, %arg3: memref<8x128xf32, #tpu.memory_space<vmem>>) attributes {dimension_semantics = [#tpu.dimension_semantics<parallel>], iteration_bounds = array<i64: 1>, scalar_prefetch = 0 : i64, scratch_operands = 0 : i64, tpu.core_type = #tpu.core_type<tc>, window_params = [{transform_indices = @transform_0, window_bounds = array<i64: 8, 1024>}, {pipeline_mode = #tpu.pipeline_mode<synchronous>, transform_indices = @transform_1, window_bounds = array<i64: 1024, 128>}, {transform_indices = @transform_2, window_bounds = array<i64: 8, 128>}]} {
    %c0 = arith.constant 0 : index
    %c0_0 = arith.constant 0 : index
    %0 = vector.load %arg1[%c0, %c0_0] : memref<8x1024xbf16, #tpu.memory_space<vmem>>, vector<8x1024xbf16>
    %c0_1 = arith.constant 0 : index
    %c0_2 = arith.constant 0 : index
    %1 = vector.load %arg2[%c0_1, %c0_2] : memref<1024x128xbf16, #tpu.memory_space<vmem>>, vector<1024x128xbf16>
    %cst = arith.constant dense<0.000000e+00> : vector<8x128xf32>
    %2 = tpu.matmul %0, %1, %cst {dimension_numbers = #tpu.dot_dimension_numbers<[1], [0], [0], [1], [0, 0, 1, 1], [], []>} : vector<8x1024xbf16>, vector<1024x128xbf16>, vector<8x128xf32> -> vector<8x128xf32>
    %c0_3 = arith.constant 0 : index
    %c0_4 = arith.constant 0 : index
    %3 = vector.load %arg3[%c0_3, %c0_4] : memref<8x128xf32, #tpu.memory_space<vmem>>, vector<8x128xf32>
    tpu.vector_store %arg3[%c0_3, %c0_4], %2 {strides = array<i32>} : memref<8x128xf32, #tpu.memory_space<vmem>>, vector<8x128xf32>,
    return
  }
  func.func @transform_0(%arg0: i32) -> (i32, i32) {
    %c0_i32 = arith.constant 0 : i32
    %c0_i32_0 = arith.constant 0 : i32
    return %arg0, %c0_i32 : i32, i32
  }
  func.func @transform_1(%arg0: i32) -> (i32, i32) {
    %c0_i32 = arith.constant 0 : i32
    %c0_i32_0 = arith.constant 0 : i32
    %c0_i32_1 = arith.constant 0 : i32
    return %c0_i32, %c0_i32_0 : i32, i32
  }
  func.func @transform_2(%arg0: i32) -> (i32, i32) {
    %c0_i32 = arith.constant 0 : i32
    %c0_i32_0 = arith.constant 0 : i32
    return %arg0, %c0_i32 : i32, i32
  }
}

</mosaic_0001>

<bundles_post_ra>
// kernel: forward.5
= control target key start
LH: loop header
LB: loop body
LE: loop exit
PB: predicated region body
PF: predicated region fallthrough
CT: control target
= control target key end

     0   :  { %s1957_s12 = smov 0   ;;  %s2159_s0 = inlined_call_operand.vmem [shape: bf16[2048,27], index: 0, kind: input, shape index: {}]   ;;  %s2160_s1 = inlined_call_operand.vmem [shape: bf16[27,128], index: 1, kind: input, shape index: {}]   ;;  %s2161_s2 = inlined_call_operand.vmem [shape: f32[1,128], index: 2, kind: input, shape index: {}]   ;;  %s2162_s3 = inlined_call_operand.vmem [shape: bf16[2048,128], index: 3, kind: output, shape index: {}]  }
   0x1 LB: > { %s1382_s13 = sadd.s32 4294967295, %s1934_s12   ;;  %p1386_p0 = scmp.ge.s32.totalorder %s1934_s12, 1  ;;  %s1934_s12 = sphi %s1957_s12, %s13_s12  }
   0x2   : > { %p138_p1 = scmp.lt.s32.totalorder %s1934_s12, 5 }
   0x4   : > { %p139_p2 = pnand %p1386_p0, %p138_p1 }
   0x5   : > { %v1894_v0 = vld [vmem:[%s2160_s1] sm:$0xff] (!%p139_p2)   ;;  %vm518_vm0 = vcmask (!%p139_p2), 1044480   ;;  %v1895_v1 = vld [vmem:[%s2160_s1 + $0x8] sm:$0x3f] (!%p139_p2)   ;;  %vm519_vm1 = vcmask (!%p139_p2), 1045504   ;;  %s1387_s18 = sshll.u32 (!%p139_p2), %s1382_s13, 6 }
   0x6   : > { %142 = sbr.rel (%p139_p2) target bundleno = 307 (0x133), region = 32  ;;  %1813 = vmatprep.subr.bf16.mxu0 (!%p139_p2), %v1894_v0  ;;  %1881 = vmatprep.subr.bf16.mxu1 (!%p139_p2), %v1894_v0  ;;  %v1936_v2 = vmov (!%p139_p2), 65535   ;;  %p163_p3 = scmp.lt.s32.totalorder (!%p139_p2), %s1387_s18, 255  ;;  %vm421_vm2 = vcmask (!%p139_p2), 220160   ;;  %v2048_v38 = vld [vmem:[%s2161_s2] ss:$0 sm:$0xff] (!%p139_p2) }
   0x7   : > { %1814 = vmatpush3.bf16.msra.mxu0 (!%p139_p2), %v1894_v0  ;;  %1883 = vmatpush3.bf16.msra.mxu1 (!%p139_p2), %v1894_v0  ;;  %v520_v3 = vsel (!%p139_p2), %vm518_vm0, 4294967295, %v1936_v2 }
   0x8   : > { %v521_v4 = vsel (!%p139_p2), %vm519_vm1, %v520_v3, 0 }
   0x9   : > { %v523_v5 = vand.u32 (!%p139_p2), %v1895_v1, %v521_v4 }
   0xb   : > { %1815 = vmatprep.subr.bf16.mxu0 (!%p139_p2), %v523_v5  ;;  %1882 = vmatprep.subr.bf16.mxu1 (!%p139_p2), %v523_v5 }
   0xc   : > { %1816 = vmatpush3.bf16.msra.mxu0 (!%p139_p2), %v523_v5  ;;  %1884 = vmatpush3.bf16.msra.mxu1 (!%p139_p2), %v523_v5 }
   0xd   : > { %s2164_s18 = smov (!%p163_p3, %s1387_s18), 255 }
   0xe   : > { %s1388_s19 = sshll.u32 %s2164_s18, 2 }
   0xf   : > { %s1979_s22 = scalar_lea.vmem %s2159_s0, %s1388_s19  ;;  %s2063_s27 = scalar_lea.vmem %s2162_s3, %s1388_s19 }
  0x10   : > { %v1896_v6 = vld [vmem:[%s1979_s22] sm:$0xff]   ;;  %v1898_v8 = vld [vmem:[%s1979_s22 + $0x8] sm:$0xff]   ;;  %v1900_v10 = vld [vmem:[%s1979_s22 + $0x10] sm:$0xff]  }
  0x11   : > { %v1897_v7 = vld [vmem:[%s1979_s22 + $0x80] sm:$0xff]   ;;  %1817 = vmatprep.mubr.msk.bf16.mxu0 %vm421_vm2, %v1896_v6  ;;  %v1899_v9 = vld [vmem:[%s1979_s22 + $0x88] sm:$0xff]   ;;  %v1901_v11 = vld [vmem:[%s1979_s22 + $0x90] sm:$0xff]  }
  0x12   : > { %1849 = vmatprep.mubr.msk.bf16.mxu1 %vm421_vm2, %v1897_v7  ;;  %1818 = vmatmul.mubr.msk.bf16.vlgmr.msra.gmra.mrb[0].mxu0 %vm421_vm2, %v1898_v8  ;;  %v1902_v12 = vld [vmem:[%s1979_s22 + $0x18] sm:$0xff]   ;;  %v1904_v14 = vld [vmem:[%s1979_s22 + $0x20] sm:$0xff]   ;;  %v1906_v16 = vld [vmem:[%s1979_s22 + $0x28] sm:$0xff]  }
  0x13   : > { %1850 = vmatmul.mubr.msk.bf16.vlgmr.msra.gmra.mrb[0].mxu1 %vm421_vm2, %v1899_v9  ;;  %1821 = vmatprep.mubr.msk.bf16.mxu0 %vm421_vm2, %v1900_v10  ;;  %v1903_v13 = vld [vmem:[%s1979_s22 + $0x98] sm:$0xff]   ;;  %v1905_v15 = vld [vmem:[%s1979_s22 + $0xa0] sm:$0xff]   ;;  %v1907_v17 = vld [vmem:[%s1979_s22 + $0xa8] sm:$0xff]  }
  0x14   : > { %1853 = vmatprep.mubr.msk.bf16.mxu1 %vm421_vm2, %v1901_v11  ;;  %v1908_v18 = vld [vmem:[%s1979_s22 + $0x30] sm:$0xff]   ;;  %v1910_v20 = vld [vmem:[%s1979_s22 + $0x38] sm:$0xff]   ;;  %v1912_v22 = vld [vmem:[%s1979_s22 + $0x40] sm:$0xff]  }
  0x15   : > { %v1909_v19 = vld [vmem:[%s1979_s22 + $0xb0] sm:$0xff]   ;;  %v1911_v21 = vld [vmem:[%s1979_s22 + $0xb8] sm:$0xff]   ;;  %v1913_v23 = vld [vmem:[%s1979_s22 + $0xc0] sm:$0xff]  }
  0x16   : > { %v1914_v24 = vld [vmem:[%s1979_s22 + $0x48] sm:$0xff]   ;;  %v1916_v26 = vld [vmem:[%s1979_s22 + $0x50] sm:$0xff]   ;;  %v1918_v28 = vld [vmem:[%s1979_s22 + $0x58] sm:$0xff]  }
  0x17   : > { %v1915_v25 = vld [vmem:[%s1979_s22 + $0xc8] sm:$0xff]   ;;  %v1917_v27 = vld [vmem:[%s1979_s22 + $0xd0] sm:$0xff]   ;;  %v1919_v29 = vld [vmem:[%s1979_s22 + $0xd8] sm:$0xff]  }
  0x18   : > { %v1920_v30 = vld [vmem:[%s1979_s22 + $0x60] sm:$0xff]   ;;  %v1922_v32 = vld [vmem:[%s1979_s22 + $0x68] sm:$0xff]   ;;  %v1924_v34 = vld [vmem:[%s1979_s22 + $0x70] sm:$0xff]  }
  0x19   : > { %v1921_v31 = vld [vmem:[%s1979_s22 + $0xe0] sm:$0xff]   ;;  %v1923_v33 = vld [vmem:[%s1979_s22 + $0xe8] sm:$0xff]   ;;  %v1925_v35 = vld [vmem:[%s1979_s22 + $0xf0] sm:$0xff]  }
  0x1a   : > { %1822 = vmatmul.mubr.msk.bf16.gmra.mrb[4].mxu0 %vm421_vm2, %v1902_v12  ;;  %v1926_v36 = vld [vmem:[%s1979_s22 + $0x78] sm:$0xff]  }
  0x1b   : > { %1854 = vmatmul.mubr.msk.bf16.gmra.mrb[4].mxu1 %vm421_vm2, %v1903_v13  ;;  %1825 = vmatprep.mubr.msk.bf16.mxu0 %vm421_vm2, %v1904_v14  ;;  %v1927_v37 = vld [vmem:[%s1979_s22 + $0xf8] sm:$0xff]  }
  0x1c   : > { %1857 = vmatprep.mubr.msk.bf16.mxu1 %vm421_vm2, %v1905_v15 }
  0x22   : > { %1826 = vmatmul.mubr.msk.bf16.gmra.mrb[8].mxu0 %vm421_vm2, %v1906_v16 }
  0x23   : > { %1858 = vmatmul.mubr.msk.bf16.gmra.mrb[8].mxu1 %vm421_vm2, %v1907_v17  ;;  %1829 = vmatprep.mubr.msk.bf16.mxu0 %vm421_vm2, %v1908_v18 }
  0x24   : > { %1861 = vmatprep.mubr.msk.bf16.mxu1 %vm421_vm2, %v1909_v19 }
  0x2a   : > { %1830 = vmatmul.mubr.msk.bf16.gmra.mrb[12].mxu0 %vm421_vm2, %v1910_v20 }
  0x2b   : > { %1862 = vmatmul.mubr.msk.bf16.gmra.mrb[12].mxu1 %vm421_vm2, %v1911_v21  ;;  %1833 = vmatprep.mubr.msk.bf16.mxu0 %vm421_vm2, %v1912_v22 }
  0x2c   : > { %1865 = vmatprep.mubr.msk.bf16.mxu1 %vm421_vm2, %v1913_v23 }
  0x32   : > { %1834 = vmatmul.mubr.msk.bf16.gmra.mrb[16].mxu0 %vm421_vm2, %v1914_v24 }
  0x33   : > { %1866 = vmatmul.mubr.msk.bf16.gmra.mrb[16].mxu1 %vm421_vm2, %v1915_v25  ;;  %1837 = vmatprep.mubr.msk.bf16.mxu0 %vm421_vm2, %v1916_v26 }
  0x34   : > { %1869 = vmatprep.mubr.msk.bf16.mxu1 %vm421_vm2, %v1917_v27 }
  0x3a   : > { %1838 = vmatmul.mubr.msk.bf16.gmra.mrb[20].mxu0 %vm421_vm2, %v1918_v28 }
  0x3b   : > { %1870 = vmatmul.mubr.msk.bf16.gmra.mrb[20].mxu1 %vm421_vm2, %v1919_v29  ;;  %1841 = vmatprep.mubr.msk.bf16.mxu0 %vm421_vm2, %v1920_v30 }
  0x3c   : > { %1873 = vmatprep.mubr.msk.bf16.mxu1 %vm421_vm2, %v1921_v31 }
  0x42   : > { %1842 = vmatmul.mubr.msk.bf16.gmra.mrb[24].mxu0 %vm421_vm2, %v1922_v32 }
  0x43   : > { %1874 = vmatmul.mubr.msk.bf16.gmra.mrb[24].mxu1 %vm421_vm2, %v1923_v33  ;;  %1845 = vmatprep.mubr.msk.bf16.mxu0 %vm421_vm2, %v1924_v34 }
  0x44   : > { %1877 = vmatprep.mubr.msk.bf16.mxu1 %vm421_vm2, %v1925_v35 }
  0x4a   : > { %1846 = vmatmul.mubr.msk.bf16.gmra.mrb[28].mxu0 %vm421_vm2, %v1926_v36 }
  0x4b   : > { %1878 = vmatmul.mubr.msk.bf16.gmra.mrb[28].mxu1 %vm421_vm2, %v1927_v37 }
  0xe5   : > { %v1819_v39 = vpop.f32.mrb[0].mxu0 }
  0xe6   : > { %v568_v40 = vadd.f32 %v1819_v39, %v2048_v38  ;;  %v1851_v41 = vpop.f32.mrb[0].mxu1  ;;  %v559_v42 = vpop.f32.mrb[1].mxu0 }
  0xe7   : > { %v696_v43 = vadd.f32 %v1851_v41, %v2048_v38  ;;  %v560_v44 = vadd.f32 %v2048_v38, %v559_v42  ;;  %v687_v45 = vpop.f32.mrb[1].mxu1  ;;  %v1820_v46 = vpop.f32.mrb[2].mxu0 }
  0xe8   : > { %vm816_vm3 = vcmp.ge.f32.partialorder %v568_v40, 0.0  ;;  %v880_v47 = vmul.f32 0.2, %v568_v40  ;;  %v688_v48 = vadd.f32 %v2048_v38, %v687_v45  ;;  %v571_v49 = vadd.f32 %v1820_v46, %v2048_v38  ;;  %v1852_v50 = vpop.f32.mrb[2].mxu1  ;;  %v562_v51 = vpop.f32.mrb[3].mxu0 }
  0xe9   : > { %vm848_vm4 = vcmp.ge.f32.partialorder %v696_v43, 0.0  ;;  %v912_v52 = vmul.f32 0.2, %v696_v43  ;;  %vm814_vm5 = vcmp.ge.f32.partialorder %v560_v44, 0.0  ;;  %v878_v53 = vmul.f32 0.2, %v560_v44 }
  0xea   : > { %vm846_vm6 = vcmp.ge.f32.partialorder %v688_v48, 0.0  ;;  %v910_v54 = vmul.f32 0.2, %v688_v48  ;;  %vm817_vm7 = vcmp.ge.f32.partialorder %v571_v49, 0.0  ;;  %v690_v55 = vpop.f32.mrb[3].mxu1  ;;  %v944_v56 = vsel %vm816_vm3, %v568_v40, %v880_v47 }
  0xeb   : > { %v881_v57 = vmul.f32 0.2, %v571_v49  ;;  %v699_v58 = vadd.f32 %v1852_v50, %v2048_v38  ;;  %v976_v59 = vsel %vm848_vm4, %v696_v43, %v912_v52  ;;  %v942_v60 = vsel %vm814_vm5, %v560_v44, %v878_v53 }
  0xec   : > { %v563_v61 = vadd.f32 %v2048_v38, %v562_v51  ;;  %v691_v62 = vadd.f32 %v2048_v38, %v690_v55  ;;  %v974_v63 = vsel %vm846_vm6, %v688_v48, %v910_v54 }
  0xed   : > { %v945_v0 = vsel %vm817_vm7, %v571_v49, %v881_v57  ;;  %vm849_vm8 = vcmp.ge.f32.partialorder %v699_v58, 0.0  ;;  %v913_v1 = vmul.f32 0.2, %v699_v58  ;;  %v1823_v2 = vpop.f32.mrb[4].mxu0 }
  0xee   : > { %v1596_v3 = vpack.c.bf16 %v945_v0, %v944_v56  ;;  %vm815_vm9 = vcmp.ge.f32.partialorder %v563_v61, 0.0  ;;  %v879_v4 = vmul.f32 0.2, %v563_v61  ;;  %vm847_vm10 = vcmp.ge.f32.partialorder %v691_v62, 0.0  ;;  %v1855_v5 = vpop.f32.mrb[4].mxu1  ;;  %v575_v6 = vpop.f32.mrb[5].mxu0 }
  0xef   : > { %v977_v7 = vsel %vm849_vm8, %v699_v58, %v913_v1  ;;  %v911_v8 = vmul.f32 0.2, %v691_v62  ;;  %v584_v9 = vadd.f32 %v1823_v2, %v2048_v38  ;;  %v712_v10 = vadd.f32 %v1855_v5, %v2048_v38  ;;  %v703_v11 = vpop.f32.mrb[5].mxu1  ;;  %v1824_v12 = vpop.f32.mrb[6].mxu0 }
  0xf0   : > { %1748 = vst [vmem:[%s2063_s27 + $0x8] sm:$0xff] %v1596_v3   ;;  %v1676_v13 = vpack.c.bf16 %v977_v7, %v976_v59  ;;  %v943_v14 = vsel %vm815_vm9, %v563_v61, %v879_v4  ;;  %v576_v15 = vadd.f32 %v2048_v38, %v575_v6  ;;  %v704_v16 = vadd.f32 %v2048_v38, %v703_v11  ;;  %v1856_v17 = vpop.f32.mrb[6].mxu1  ;;  %v578_v18 = vpop.f32.mrb[7].mxu0 }
  0xf1   : > { %v1591_v19 = vpack.c.bf16 %v943_v14, %v942_v60  ;;  %v975_v20 = vsel %vm847_vm10, %v691_v62, %v911_v8  ;;  %vm820_vm11 = vcmp.ge.f32.partialorder %v584_v9, 0.0  ;;  %v884_v21 = vmul.f32 0.2, %v584_v9  ;;  %v706_v22 = vpop.f32.mrb[7].mxu1 }
  0xf2   : > { %1764 = vst [vmem:[%s2063_s27 + $0x88] sm:$0xff] %v1676_v13   ;;  %v1671_v23 = vpack.c.bf16 %v975_v20, %v974_v63  ;;  %vm852_vm12 = vcmp.ge.f32.partialorder %v712_v10, 0.0  ;;  %v916_v24 = vmul.f32 0.2, %v712_v10  ;;  %vm818_vm13 = vcmp.ge.f32.partialorder %v576_v15, 0.0 }
  0xf3   : > { %1592 = vst [vmem:[%s2063_s27] sm:$0xff] %v1591_v19   ;;  %v948_v25 = vsel %vm820_vm11, %v584_v9, %v884_v21  ;;  %v882_v26 = vmul.f32 0.2, %v576_v15  ;;  %v914_v27 = vmul.f32 0.2, %v704_v16  ;;  %v587_v28 = vadd.f32 %v1824_v12, %v2048_v38 }
  0xf4   : > { %1763 = vst [vmem:[%s2063_s27 + $0x80] sm:$0xff] %v1671_v23   ;;  %v715_v29 = vadd.f32 %v1856_v17, %v2048_v38  ;;  %v579_v30 = vadd.f32 %v2048_v38, %v578_v18  ;;  %v980_v31 = vsel %vm852_vm12, %v712_v10, %v916_v24  ;;  %vm850_vm14 = vcmp.ge.f32.partialorder %v704_v16, 0.0 }
  0xf5   : > { %v946_v32 = vsel %vm818_vm13, %v576_v15, %v882_v26  ;;  %v707_v33 = vadd.f32 %v2048_v38, %v706_v22  ;;  %v1827_v34 = vpop.f32.mrb[8].mxu0  ;;  %vm821_vm15 = vcmp.ge.f32.partialorder %v587_v28, 0.0  ;;  %v885_v35 = vmul.f32 0.2, %v587_v28 }
  0xf6   : > { %vm853_vm0 = vcmp.ge.f32.partialorder %v715_v29, 0.0  ;;  %v917_v36 = vmul.f32 0.2, %v715_v29  ;;  %vm819_vm1 = vcmp.ge.f32.partialorder %v579_v30, 0.0  ;;  %v883_v37 = vmul.f32 0.2, %v579_v30 }
  0xf7   : > { %vm851_vm2 = vcmp.ge.f32.partialorder %v707_v33, 0.0  ;;  %v915_v39 = vmul.f32 0.2, %v707_v33  ;;  %v978_v40 = vsel %vm850_vm14, %v704_v16, %v914_v27  ;;  %v949_v41 = vsel %vm821_vm15, %v587_v28, %v885_v35  ;;  %v1859_v44 = vpop.f32.mrb[8].mxu1  ;;  %v591_v45 = vpop.f32.mrb[9].mxu0 }
  0xf8   : > { %v981_v42 = vsel %vm853_vm0, %v715_v29, %v917_v36  ;;  %v600_v43 = vadd.f32 %v1827_v34, %v2048_v38  ;;  %v1606_v46 = vpack.c.bf16 %v949_v41, %v948_v25  ;;  %v947_v48 = vsel %vm819_vm1, %v579_v30, %v883_v37  ;;  %v719_v50 = vpop.f32.mrb[9].mxu1  ;;  %v1828_v51 = vpop.f32.mrb[10].mxu0 }
  0xf9   : > { %v1686_v47 = vpack.c.bf16 %v981_v42, %v980_v31  ;;  %v979_v49 = vsel %vm851_vm2, %v707_v33, %v915_v39  ;;  %v1601_v52 = vpack.c.bf16 %v947_v48, %v946_v32  ;;  %v1860_v55 = vpop.f32.mrb[10].mxu1  ;;  %v594_v56 = vpop.f32.mrb[11].mxu0  ;;  %v728_v57 = vadd.f32 %v1859_v44, %v2048_v38 }
  0xfa   : > { %v1681_v53 = vpack.c.bf16 %v979_v49, %v978_v40  ;;  %vm824_vm3 = vcmp.ge.f32.partialorder %v600_v43, 0.0  ;;  %v888_v54 = vmul.f32 0.2, %v600_v43  ;;  %1750 = vst [vmem:[%s2063_s27 + $0x18] sm:$0xff] %v1606_v46   ;;  %v592_v58 = vadd.f32 %v2048_v38, %v591_v45  ;;  %v722_v61 = vpop.f32.mrb[11].mxu1 }
  0xfb   : > { %1766 = vst [vmem:[%s2063_s27 + $0x98] sm:$0xff] %v1686_v47   ;;  %v720_v59 = vadd.f32 %v2048_v38, %v719_v50  ;;  %v603_v60 = vadd.f32 %v1828_v51, %v2048_v38  ;;  %1749 = vst [vmem:[%s2063_s27 + $0x10] sm:$0xff] %v1601_v52   ;;  %v731_v63 = vadd.f32 %v1860_v55, %v2048_v38  ;;  %vm856_vm4 = vcmp.ge.f32.partialorder %v728_v57, 0.0 }
  0xfc   : > { %1765 = vst [vmem:[%s2063_s27 + $0x90] sm:$0xff] %v1681_v53   ;;  %v952_v62 = vsel %vm824_vm3, %v600_v43, %v888_v54  ;;  %v595_v0 = vadd.f32 %v2048_v38, %v594_v56  ;;  %v723_v1 = vadd.f32 %v2048_v38, %v722_v61  ;;  %v920_v2 = vmul.f32 0.2, %v728_v57 }
  0xfd   : > { %vm822_vm5 = vcmp.ge.f32.partialorder %v592_v58, 0.0  ;;  %v886_v3 = vmul.f32 0.2, %v592_v58  ;;  %vm854_vm6 = vcmp.ge.f32.partialorder %v720_v59, 0.0  ;;  %v918_v4 = vmul.f32 0.2, %v720_v59 }
  0xfe   : > { %vm825_vm7 = vcmp.ge.f32.partialorder %v603_v60, 0.0  ;;  %v889_v5 = vmul.f32 0.2, %v603_v60  ;;  %v984_v6 = vsel %vm856_vm4, %v728_v57, %v920_v2  ;;  %vm857_vm8 = vcmp.ge.f32.partialorder %v731_v63, 0.0  ;;  %v1831_v9 = vpop.f32.mrb[12].mxu0  ;;  %v1863_v10 = vpop.f32.mrb[12].mxu1 }
  0xff   : > { %v950_v7 = vsel %vm822_vm5, %v592_v58, %v886_v3  ;;  %v921_v8 = vmul.f32 0.2, %v731_v63  ;;  %v982_v11 = vsel %vm854_vm6, %v720_v59, %v918_v4  ;;  %vm823_vm9 = vcmp.ge.f32.partialorder %v595_v0, 0.0  ;;  %v607_v14 = vpop.f32.mrb[13].mxu0  ;;  %v735_v15 = vpop.f32.mrb[13].mxu1 }
 0x100   : > { %v953_v12 = vsel %vm825_vm7, %v603_v60, %v889_v5  ;;  %v887_v13 = vmul.f32 0.2, %v595_v0  ;;  %vm855_vm10 = vcmp.ge.f32.partialorder %v723_v1, 0.0  ;;  %v919_v18 = vmul.f32 0.2, %v723_v1  ;;  %v1832_v19 = vpop.f32.mrb[14].mxu0 }
 0x101   : > { %v1616_v16 = vpack.c.bf16 %v953_v12, %v952_v62  ;;  %v985_v17 = vsel %vm857_vm8, %v731_v63, %v921_v8  ;;  %v1864_v20 = vpop.f32.mrb[14].mxu1  ;;  %v616_v23 = vadd.f32 %v1831_v9, %v2048_v38  ;;  %v744_v24 = vadd.f32 %v1863_v10, %v2048_v38  ;;  %v610_v25 = vpop.f32.mrb[15].mxu0 }
 0x102   : > { %v1696_v21 = vpack.c.bf16 %v985_v17, %v984_v6  ;;  %v951_v22 = vsel %vm823_vm9, %v595_v0, %v887_v13  ;;  %v738_v26 = vpop.f32.mrb[15].mxu1  ;;  %v983_v28 = vsel %vm855_vm10, %v723_v1, %v919_v18  ;;  %v608_v29 = vadd.f32 %v2048_v38, %v607_v14 }
 0x103   : > { %1752 = vst [vmem:[%s2063_s27 + $0x28] sm:$0xff] %v1616_v16   ;;  %v1611_v27 = vpack.c.bf16 %v951_v22, %v950_v7  ;;  %v736_v30 = vadd.f32 %v2048_v38, %v735_v15  ;;  %v1691_v31 = vpack.c.bf16 %v983_v28, %v982_v11  ;;  %vm828_vm11 = vcmp.ge.f32.partialorder %v616_v23, 0.0 }
 0x104   : > { %1768 = vst [vmem:[%s2063_s27 + $0xa8] sm:$0xff] %v1696_v21   ;;  %v892_v32 = vmul.f32 0.2, %v616_v23  ;;  %vm860_vm12 = vcmp.ge.f32.partialorder %v744_v24, 0.0  ;;  %v924_v33 = vmul.f32 0.2, %v744_v24  ;;  %v619_v37 = vadd.f32 %v1832_v19, %v2048_v38 }
 0x105   : > { %1751 = vst [vmem:[%s2063_s27 + $0x20] sm:$0xff] %v1611_v27   ;;  %vm826_vm13 = vcmp.ge.f32.partialorder %v608_v29, 0.0  ;;  %v890_v34 = vmul.f32 0.2, %v608_v29  ;;  %vm858_vm14 = vcmp.ge.f32.partialorder %v736_v30, 0.0  ;;  %1767 = vst [vmem:[%s2063_s27 + $0xa0] sm:$0xff] %v1691_v31   ;;  %v747_v39 = vadd.f32 %v1864_v20, %v2048_v38 }
 0x106   : > { %v956_v35 = vsel %vm828_vm11, %v616_v23, %v892_v32  ;;  %v922_v36 = vmul.f32 0.2, %v736_v30  ;;  %v1835_v40 = vpop.f32.mrb[16].mxu0  ;;  %v1867_v41 = vpop.f32.mrb[16].mxu1  ;;  %v988_v42 = vsel %vm860_vm12, %v744_v24, %v924_v33  ;;  %v611_v44 = vadd.f32 %v2048_v38, %v610_v25 }
 0x107   : > { %v954_v43 = vsel %vm826_vm13, %v608_v29, %v890_v34  ;;  %v739_v45 = vadd.f32 %v2048_v38, %v738_v26  ;;  %v623_v46 = vpop.f32.mrb[17].mxu0  ;;  %v751_v47 = vpop.f32.mrb[17].mxu1  ;;  %vm829_vm15 = vcmp.ge.f32.partialorder %v619_v37, 0.0  ;;  %v893_v49 = vmul.f32 0.2, %v619_v37 }
 0x108   : > { %v986_v48 = vsel %vm858_vm14, %v736_v30, %v922_v36  ;;  %vm861_vm0 = vcmp.ge.f32.partialorder %v747_v39, 0.0  ;;  %v1836_v50 = vpop.f32.mrb[18].mxu0  ;;  %v1868_v51 = vpop.f32.mrb[18].mxu1  ;;  %v925_v52 = vmul.f32 0.2, %v747_v39  ;;  %vm827_vm1 = vcmp.ge.f32.partialorder %v611_v44, 0.0 }
 0x109   : > { %v891_v53 = vmul.f32 0.2, %v611_v44  ;;  %vm859_vm2 = vcmp.ge.f32.partialorder %v739_v45, 0.0  ;;  %v957_v54 = vsel %vm829_vm15, %v619_v37, %v893_v49  ;;  %v923_v55 = vmul.f32 0.2, %v739_v45  ;;  %v626_v58 = vpop.f32.mrb[19].mxu0 }
 0x10a   : > { %v632_v56 = vadd.f32 %v1835_v40, %v2048_v38  ;;  %v760_v57 = vadd.f32 %v1867_v41, %v2048_v38  ;;  %v754_v59 = vpop.f32.mrb[19].mxu1  ;;  %v1626_v60 = vpack.c.bf16 %v957_v54, %v956_v35  ;;  %v989_v61 = vsel %vm861_vm0, %v747_v39, %v925_v52 }
 0x10b   : > { %v955_v62 = vsel %vm827_vm1, %v611_v44, %v891_v53  ;;  %v624_v63 = vadd.f32 %v2048_v38, %v623_v46  ;;  %v1706_v0 = vpack.c.bf16 %v989_v61, %v988_v42  ;;  %v987_v2 = vsel %vm859_vm2, %v739_v45, %v923_v55 }
 0x10c   : > { %v1621_v1 = vpack.c.bf16 %v955_v62, %v954_v43  ;;  %vm832_vm3 = vcmp.ge.f32.partialorder %v632_v56, 0.0  ;;  %1754 = vst [vmem:[%s2063_s27 + $0x38] sm:$0xff] %v1626_v60   ;;  %v1701_v3 = vpack.c.bf16 %v987_v2, %v986_v48  ;;  %v896_v4 = vmul.f32 0.2, %v632_v56 }
 0x10d   : > { %vm864_vm4 = vcmp.ge.f32.partialorder %v760_v57, 0.0  ;;  %v928_v5 = vmul.f32 0.2, %v760_v57  ;;  %v1839_v6 = vpop.f32.mrb[20].mxu0  ;;  %1770 = vst [vmem:[%s2063_s27 + $0xb8] sm:$0xff] %v1706_v0   ;;  %vm830_vm5 = vcmp.ge.f32.partialorder %v624_v63, 0.0  ;;  %v752_v8 = vadd.f32 %v2048_v38, %v751_v47 }
 0x10e   : > { %1753 = vst [vmem:[%s2063_s27 + $0x30] sm:$0xff] %v1621_v1   ;;  %v894_v7 = vmul.f32 0.2, %v624_v63  ;;  %v635_v9 = vadd.f32 %v1836_v50, %v2048_v38  ;;  %v1871_v10 = vpop.f32.mrb[20].mxu1  ;;  %v639_v11 = vpop.f32.mrb[21].mxu0  ;;  %1769 = vst [vmem:[%s2063_s27 + $0xb0] sm:$0xff] %v1701_v3   ;;  %v960_v12 = vsel %vm832_vm3, %v632_v56, %v896_v4  ;;  %v763_v14 = vadd.f32 %v1868_v51, %v2048_v38 }
 0x10f   : > { %v992_v13 = vsel %vm864_vm4, %v760_v57, %v928_v5  ;;  %v627_v15 = vadd.f32 %v2048_v38, %v626_v58  ;;  %v767_v16 = vpop.f32.mrb[21].mxu1  ;;  %v1840_v17 = vpop.f32.mrb[22].mxu0  ;;  %vm862_vm6 = vcmp.ge.f32.partialorder %v752_v8, 0.0  ;;  %v926_v19 = vmul.f32 0.2, %v752_v8 }
 0x110   : > { %v958_v18 = vsel %vm830_vm5, %v624_v63, %v894_v7  ;;  %vm833_vm7 = vcmp.ge.f32.partialorder %v635_v9, 0.0  ;;  %v1872_v20 = vpop.f32.mrb[22].mxu1  ;;  %v642_v21 = vpop.f32.mrb[23].mxu0  ;;  %v897_v22 = vmul.f32 0.2, %v635_v9  ;;  %vm865_vm8 = vcmp.ge.f32.partialorder %v763_v14, 0.0 }
 0x111   : > { %v929_v23 = vmul.f32 0.2, %v763_v14  ;;  %vm831_vm9 = vcmp.ge.f32.partialorder %v627_v15, 0.0  ;;  %v990_v24 = vsel %vm862_vm6, %v752_v8, %v926_v19  ;;  %v895_v25 = vmul.f32 0.2, %v627_v15  ;;  %v770_v28 = vpop.f32.mrb[23].mxu1 }
 0x112   : > { %v755_v26 = vadd.f32 %v2048_v38, %v754_v59  ;;  %v648_v27 = vadd.f32 %v1839_v6, %v2048_v38  ;;  %v961_v29 = vsel %vm833_vm7, %v635_v9, %v897_v22  ;;  %v776_v31 = vadd.f32 %v1871_v10, %v2048_v38 }
 0x113   : > { %v993_v30 = vsel %vm865_vm8, %v763_v14, %v929_v23  ;;  %v640_v32 = vadd.f32 %v2048_v38, %v639_v11  ;;  %v1636_v33 = vpack.c.bf16 %v961_v29, %v960_v12  ;;  %v959_v35 = vsel %vm831_vm9, %v627_v15, %v895_v25 }
 0x114   : > { %v1716_v34 = vpack.c.bf16 %v993_v30, %v992_v13  ;;  %vm863_vm10 = vcmp.ge.f32.partialorder %v755_v26, 0.0  ;;  %v1631_v36 = vpack.c.bf16 %v959_v35, %v958_v18  ;;  %v927_v37 = vmul.f32 0.2, %v755_v26 }
 0x115   : > { %vm836_vm11 = vcmp.ge.f32.partialorder %v648_v27, 0.0  ;;  %v900_v39 = vmul.f32 0.2, %v648_v27  ;;  %v1843_v40 = vpop.f32.mrb[24].mxu0  ;;  %1756 = vst [vmem:[%s2063_s27 + $0x48] sm:$0xff] %v1636_v33   ;;  %vm868_vm12 = vcmp.ge.f32.partialorder %v776_v31, 0.0  ;;  %v768_v45 = vadd.f32 %v2048_v38, %v767_v16 }
 0x116   : > { %1772 = vst [vmem:[%s2063_s27 + $0xc8] sm:$0xff] %v1716_v34   ;;  %v932_v41 = vmul.f32 0.2, %v776_v31  ;;  %vm834_vm13 = vcmp.ge.f32.partialorder %v640_v32, 0.0  ;;  %v898_v42 = vmul.f32 0.2, %v640_v32  ;;  %v991_v43 = vsel %vm863_vm10, %v755_v26, %v927_v37 }
 0x117   : > { %1755 = vst [vmem:[%s2063_s27 + $0x40] sm:$0xff] %v1631_v36   ;;  %v964_v44 = vsel %vm836_vm11, %v648_v27, %v900_v39  ;;  %v651_v46 = vadd.f32 %v1840_v17, %v2048_v38  ;;  %v1875_v47 = vpop.f32.mrb[24].mxu1  ;;  %v655_v48 = vpop.f32.mrb[25].mxu0  ;;  %v1711_v49 = vpack.c.bf16 %v991_v43, %v990_v24  ;;  %v779_v52 = vadd.f32 %v1872_v20, %v2048_v38 }
 0x118   : > { %v996_v50 = vsel %vm868_vm12, %v776_v31, %v932_v41  ;;  %v962_v51 = vsel %vm834_vm13, %v640_v32, %v898_v42  ;;  %v783_v53 = vpop.f32.mrb[25].mxu1  ;;  %v1844_v54 = vpop.f32.mrb[26].mxu0  ;;  %vm866_vm14 = vcmp.ge.f32.partialorder %v768_v45, 0.0  ;;  %v930_v55 = vmul.f32 0.2, %v768_v45 }
 0x119   : > { %vm837_vm15 = vcmp.ge.f32.partialorder %v651_v46, 0.0  ;;  %v901_v56 = vmul.f32 0.2, %v651_v46  ;;  %1771 = vst [vmem:[%s2063_s27 + $0xc0] sm:$0xff] %v1711_v49   ;;  %vm869_vm0 = vcmp.ge.f32.partialorder %v779_v52, 0.0  ;;  %v643_v58 = vadd.f32 %v2048_v38, %v642_v21  ;;  %v1876_v60 = vpop.f32.mrb[26].mxu1 }
 0x11a   : > { %v933_v57 = vmul.f32 0.2, %v779_v52  ;;  %v771_v59 = vadd.f32 %v2048_v38, %v770_v28  ;;  %v658_v61 = vpop.f32.mrb[27].mxu0  ;;  %v994_v62 = vsel %vm866_vm14, %v768_v45, %v930_v55  ;;  %v664_v0 = vadd.f32 %v1843_v40, %v2048_v38  ;;  %v786_v2 = vpop.f32.mrb[27].mxu1 }
 0x11b   : > { %v965_v63 = vsel %vm837_vm15, %v651_v46, %v901_v56  ;;  %v792_v1 = vadd.f32 %v1875_v47, %v2048_v38  ;;  %vm835_vm1 = vcmp.ge.f32.partialorder %v643_v58, 0.0  ;;  %v899_v5 = vmul.f32 0.2, %v643_v58 }
 0x11c   : > { %v1646_v3 = vpack.c.bf16 %v965_v63, %v964_v44  ;;  %v997_v4 = vsel %vm869_vm0, %v779_v52, %v933_v57  ;;  %vm867_vm2 = vcmp.ge.f32.partialorder %v771_v59, 0.0  ;;  %v931_v7 = vmul.f32 0.2, %v771_v59 }
 0x11d   : > { %v1726_v6 = vpack.c.bf16 %v997_v4, %v996_v50  ;;  %vm840_vm3 = vcmp.ge.f32.partialorder %v664_v0, 0.0  ;;  %v1847_v8 = vpop.f32.mrb[28].mxu0  ;;  %v963_v9 = vsel %vm835_vm1, %v643_v58, %v899_v5  ;;  %v904_v10 = vmul.f32 0.2, %v664_v0 }
 0x11e   : > { %1758 = vst [vmem:[%s2063_s27 + $0x58] sm:$0xff] %v1646_v3   ;;  %vm872_vm4 = vcmp.ge.f32.partialorder %v792_v1, 0.0  ;;  %v936_v11 = vmul.f32 0.2, %v792_v1  ;;  %v1879_v12 = vpop.f32.mrb[28].mxu1  ;;  %v1641_v13 = vpack.c.bf16 %v963_v9, %v962_v51  ;;  %v995_v14 = vsel %vm867_vm2, %v771_v59, %v931_v7  ;;  %v671_v17 = vpop.f32.mrb[29].mxu0 }
 0x11f   : > { %1774 = vst [vmem:[%s2063_s27 + $0xd8] sm:$0xff] %v1726_v6   ;;  %v656_v15 = vadd.f32 %v2048_v38, %v655_v48  ;;  %v784_v16 = vadd.f32 %v2048_v38, %v783_v53  ;;  %v799_v18 = vpop.f32.mrb[29].mxu1  ;;  %v1721_v19 = vpack.c.bf16 %v995_v14, %v994_v62  ;;  %v968_v20 = vsel %vm840_vm3, %v664_v0, %v904_v10  ;;  %v1848_v23 = vpop.f32.mrb[30].mxu0 }
 0x120   : > { %v1000_v21 = vsel %vm872_vm4, %v792_v1, %v936_v11  ;;  %v667_v22 = vadd.f32 %v1844_v54, %v2048_v38  ;;  %v1880_v24 = vpop.f32.mrb[30].mxu1  ;;  %1757 = vst [vmem:[%s2063_s27 + $0x50] sm:$0xff] %v1641_v13   ;;  %v795_v28 = vadd.f32 %v1876_v60, %v2048_v38  ;;  %v659_v29 = vadd.f32 %v2048_v38, %v658_v61  ;;  %v674_v30 = vpop.f32.mrb[31].mxu0 }
 0x121   : > { %vm838_vm5 = vcmp.ge.f32.partialorder %v656_v15, 0.0  ;;  %v902_v25 = vmul.f32 0.2, %v656_v15  ;;  %vm870_vm6 = vcmp.ge.f32.partialorder %v784_v16, 0.0  ;;  %v934_v26 = vmul.f32 0.2, %v784_v16 }
 0x122   : > { %1773 = vst [vmem:[%s2063_s27 + $0xd0] sm:$0xff] %v1721_v19   ;;  %vm841_vm7 = vcmp.ge.f32.partialorder %v667_v22, 0.0  ;;  %v905_v27 = vmul.f32 0.2, %v667_v22  ;;  %v802_v31 = vpop.f32.mrb[31].mxu1  ;;  %v787_v34 = vadd.f32 %v2048_v38, %v786_v2  ;;  %v680_v35 = vadd.f32 %v1847_v8, %v2048_v38 }
 0x123   : > { %v966_v32 = vsel %vm838_vm5, %v656_v15, %v902_v25  ;;  %v998_v33 = vsel %vm870_vm6, %v784_v16, %v934_v26  ;;  %vm873_vm8 = vcmp.ge.f32.partialorder %v795_v28, 0.0  ;;  %v937_v37 = vmul.f32 0.2, %v795_v28 }
 0x124   : > { %v969_v36 = vsel %vm841_vm7, %v667_v22, %v905_v27  ;;  %vm839_vm9 = vcmp.ge.f32.partialorder %v659_v29, 0.0  ;;  %v903_v40 = vmul.f32 0.2, %v659_v29  ;;  %vm871_vm10 = vcmp.ge.f32.partialorder %v787_v34, 0.0 }
 0x125   : > { %v1656_v39 = vpack.c.bf16 %v969_v36, %v968_v20  ;;  %v935_v41 = vmul.f32 0.2, %v787_v34  ;;  %v1001_v42 = vsel %vm873_vm8, %v795_v28, %v937_v37  ;;  %vm844_vm11 = vcmp.ge.f32.partialorder %v680_v35, 0.0 }
 0x126   : > { %v908_v43 = vmul.f32 0.2, %v680_v35  ;;  %v808_v44 = vadd.f32 %v1879_v12, %v2048_v38  ;;  %v1736_v45 = vpack.c.bf16 %v1001_v42, %v1000_v21  ;;  %v967_v46 = vsel %vm839_vm9, %v659_v29, %v903_v40 }
 0x127   : > { %1760 = vst [vmem:[%s2063_s27 + $0x68] sm:$0xff] %v1656_v39   ;;  %v999_v47 = vsel %vm871_vm10, %v787_v34, %v935_v41  ;;  %v672_v48 = vadd.f32 %v2048_v38, %v671_v17  ;;  %v1651_v49 = vpack.c.bf16 %v967_v46, %v966_v32  ;;  %v800_v53 = vadd.f32 %v2048_v38, %v799_v18 }
 0x128   : > { %v1731_v50 = vpack.c.bf16 %v999_v47, %v998_v33  ;;  %1776 = vst [vmem:[%s2063_s27 + $0xe8] sm:$0xff] %v1736_v45   ;;  %v972_v51 = vsel %vm844_vm11, %v680_v35, %v908_v43  ;;  %v940_v52 = vmul.f32 0.2, %v808_v44  ;;  %v683_v54 = vadd.f32 %v1848_v23, %v2048_v38 }
 0x129   : > { %1759 = vst [vmem:[%s2063_s27 + $0x60] sm:$0xff] %v1651_v49   ;;  %v811_v55 = vadd.f32 %v1880_v24, %v2048_v38  ;;  %v675_v56 = vadd.f32 %v2048_v38, %v674_v30  ;;  %v803_v57 = vadd.f32 %v2048_v38, %v802_v31  ;;  %vm876_vm12 = vcmp.ge.f32.partialorder %v808_v44, 0.0 }
 0x12a   : > { %1775 = vst [vmem:[%s2063_s27 + $0xe0] sm:$0xff] %v1731_v50   ;;  %vm842_vm13 = vcmp.ge.f32.partialorder %v672_v48, 0.0  ;;  %v906_v58 = vmul.f32 0.2, %v672_v48  ;;  %v938_v59 = vmul.f32 0.2, %v800_v53  ;;  %v1004_v63 = vsel %vm876_vm12, %v808_v44, %v940_v52 }
 0x12b   : > { %vm845_vm14 = vcmp.ge.f32.partialorder %v683_v54, 0.0  ;;  %v909_v60 = vmul.f32 0.2, %v683_v54  ;;  %vm877_vm15 = vcmp.ge.f32.partialorder %v811_v55, 0.0  ;;  %v941_v61 = vmul.f32 0.2, %v811_v55 }
 0x12c   : > { %vm874_vm0 = vcmp.ge.f32.partialorder %v800_v53, 0.0  ;;  %vm843_vm1 = vcmp.ge.f32.partialorder %v675_v56, 0.0  ;;  %v907_v62 = vmul.f32 0.2, %v675_v56  ;;  %vm875_vm2 = vcmp.ge.f32.partialorder %v803_v57, 0.0 }
 0x12d   : > { %v973_v0 = vsel %vm845_vm14, %v683_v54, %v909_v60  ;;  %v1005_v1 = vsel %vm877_vm15, %v811_v55, %v941_v61  ;;  %v939_v38 = vmul.f32 0.2, %v803_v57  ;;  %v970_v2 = vsel %vm842_vm13, %v672_v48, %v906_v58 }
 0x12e   : > { %v1666_v3 = vpack.c.bf16 %v973_v0, %v972_v51  ;;  %v1746_v4 = vpack.c.bf16 %v1005_v1, %v1004_v63  ;;  %v971_v5 = vsel %vm843_vm1, %v675_v56, %v907_v62  ;;  %v1002_v6 = vsel %vm874_vm0, %v800_v53, %v938_v59 }
 0x12f   : > { %v1661_v7 = vpack.c.bf16 %v971_v5, %v970_v2  ;;  %v1003_v8 = vsel %vm875_vm2, %v803_v57, %v939_v38 }
 0x130   : > { %1762 = vst [vmem:[%s2063_s27 + $0x78] sm:$0xff] %v1666_v3   ;;  %1778 = vst [vmem:[%s2063_s27 + $0xf8] sm:$0xff] %v1746_v4   ;;  %v1741_v9 = vpack.c.bf16 %v1003_v8, %v1002_v6 }
 0x131   : > { %1761 = vst [vmem:[%s2063_s27 + $0x70] sm:$0xff] %v1661_v7  }
 0x132   : > { %1777 = vst [vmem:[%s2063_s27 + $0xf0] sm:$0xff] %v1741_v9  }
 0x133 PF: > { %s13_s12 = sadd.s32 1, %s1934_s12  }
 0x134   : > { %p10_p4 = scmp.ge.s32.totalorder %s13_s12, 6  }
 0x136   :  { %12 = sbr.rel (!%p10_p4) target bundleno = 1 (0x1), region = 62 }

// kernel: forward.6
= control target key start
LH: loop header
LB: loop body
LE: loop exit
PB: predicated region body
PF: predicated region fallthrough
CT: control target
= control target key end

     0   :  { %s1997_s1 = inlined_call_operand.vmem [shape: bf16[128,128], index: 1, kind: input, shape index: {}]   ;;  %s1998_s0 = inlined_call_operand.vmem [shape: bf16[512,128], index: 0, kind: input, shape index: {}]   ;;  %s1999_s2 = inlined_call_operand.vmem [shape: f32[1,128], index: 2, kind: input, shape index: {}]   ;;  %s2000_s3 = inlined_call_operand.vmem [shape: bf16[512,128], index: 3, kind: output, shape index: {}]  }
   0x1   :  { %v1643_v0 = vld [vmem:[%s1997_s1] sm:$0xff]   ;;  %v1644_v1 = vld [vmem:[%s1997_s1 + $0x8] sm:$0xff]   ;;  %v1645_v2 = vld [vmem:[%s1997_s1 + $0x10] sm:$0xff]  }
   0x2   :  { %1547 = vmatprep.subr.bf16.mxu0 %v1643_v0  ;;  %1627 = vmatprep.subr.bf16.mxu1 %v1643_v0  ;;  %v1646_v3 = vld [vmem:[%s1997_s1 + $0x18] sm:$0xff]   ;;  %v1651_v4 = vld [vmem:[%s1998_s0] sm:$0xff]   ;;  %v1648_v7 = vld [vmem:[%s1997_s1 + $0x28] sm:$0xff]  }
   0x3   :  { %1548 = vmatpush3.bf16.msra.mxu0 %v1643_v0  ;;  %1635 = vmatpush3.bf16.msra.mxu1 %v1643_v0  ;;  %v1652_v5 = vld [vmem:[%s1998_s0 + $0x80] sm:$0xff]   ;;  %v1649_v8 = vld [vmem:[%s1997_s1 + $0x30] sm:$0xff]   ;;  %v1650_v9 = vld [vmem:[%s1997_s1 + $0x38] sm:$0xff]  }
   0x4   :  { %1549 = vmatprep.subr.bf16.mxu0 %v1644_v1  ;;  %1628 = vmatprep.subr.bf16.mxu1 %v1644_v1  ;;  %v1647_v6 = vld [vmem:[%s1997_s1 + $0x20] sm:$0xff]   ;;  %v1653_v10 = vld [vmem:[%s1998_s0 + $0x8] sm:$0xff]   ;;  %v1655_v12 = vld [vmem:[%s1998_s0 + $0x10] sm:$0xff]  }
   0x5   :  { %1563 = vmatprep.mubr.bf16.mxu0 %v1651_v4  ;;  %1595 = vmatprep.mubr.bf16.mxu1 %v1652_v5  ;;  %v1654_v11 = vld [vmem:[%s1998_s0 + $0x88] sm:$0xff]   ;;  %v1656_v13 = vld [vmem:[%s1998_s0 + $0x90] sm:$0xff]   ;;  %v1657_v14 = vld [vmem:[%s1998_s0 + $0x18] sm:$0xff]  }
   0x6   :  { %v1658_v15 = vld [vmem:[%s1998_s0 + $0x98] sm:$0xff]   ;;  %v1659_v16 = vld [vmem:[%s1998_s0 + $0x20] sm:$0xff]   ;;  %v1661_v18 = vld [vmem:[%s1998_s0 + $0x28] sm:$0xff]  }
   0x7   :  { %1550 = vmatpush3.bf16.msra.mxu0 %v1644_v1  ;;  %1636 = vmatpush3.bf16.msra.mxu1 %v1644_v1  ;;  %v1660_v17 = vld [vmem:[%s1998_s0 + $0xa0] sm:$0xff]   ;;  %v1662_v19 = vld [vmem:[%s1998_s0 + $0xa8] sm:$0xff]   ;;  %v1663_v20 = vld [vmem:[%s1998_s0 + $0x30] sm:$0xff]  }
   0x8   :  { %1551 = vmatprep.subr.bf16.mxu0 %v1645_v2  ;;  %1629 = vmatprep.subr.bf16.mxu1 %v1645_v2  ;;  %v1664_v21 = vld [vmem:[%s1998_s0 + $0xb0] sm:$0xff]   ;;  %v1665_v22 = vld [vmem:[%s1998_s0 + $0x38] sm:$0xff]   ;;  %v1667_v24 = vld [vmem:[%s1998_s0 + $0x40] sm:$0xff]  }
   0x9   :  { %v1666_v23 = vld [vmem:[%s1998_s0 + $0xb8] sm:$0xff]   ;;  %v1668_v25 = vld [vmem:[%s1998_s0 + $0xc0] sm:$0xff]   ;;  %v1669_v26 = vld [vmem:[%s1998_s0 + $0x48] sm:$0xff]  }
   0xa   :  { %v1670_v27 = vld [vmem:[%s1998_s0 + $0xc8] sm:$0xff]   ;;  %v1671_v28 = vld [vmem:[%s1998_s0 + $0x50] sm:$0xff]   ;;  %v1673_v30 = vld [vmem:[%s1998_s0 + $0x58] sm:$0xff]  }
   0xb   :  { %1552 = vmatpush3.bf16.msra.mxu0 %v1645_v2  ;;  %1637 = vmatpush3.bf16.msra.mxu1 %v1645_v2  ;;  %v1672_v29 = vld [vmem:[%s1998_s0 + $0xd0] sm:$0xff]   ;;  %v1674_v31 = vld [vmem:[%s1998_s0 + $0xd8] sm:$0xff]   ;;  %v1675_v32 = vld [vmem:[%s1998_s0 + $0x60] sm:$0xff]  }
   0xc   :  { %1553 = vmatprep.subr.bf16.mxu0 %v1646_v3  ;;  %1630 = vmatprep.subr.bf16.mxu1 %v1646_v3  ;;  %v1676_v33 = vld [vmem:[%s1998_s0 + $0xe0] sm:$0xff]   ;;  %v1677_v34 = vld [vmem:[%s1998_s0 + $0x68] sm:$0xff]   ;;  %v1679_v36 = vld [vmem:[%s1998_s0 + $0x70] sm:$0xff]  }
   0xd   :  { %v1678_v35 = vld [vmem:[%s1998_s0 + $0xe8] sm:$0xff]   ;;  %v1680_v37 = vld [vmem:[%s1998_s0 + $0xf0] sm:$0xff]   ;;  %v1681_v38 = vld [vmem:[%s1998_s0 + $0x78] sm:$0xff]  }
   0xe   :  { %v1682_v39 = vld [vmem:[%s1998_s0 + $0xf8] sm:$0xff]   ;;  %v1826_v40 = vld [vmem:[%s1999_s2] ss:$0 sm:$0xff] }
   0xf   :  { %1554 = vmatpush3.bf16.msra.mxu0 %v1646_v3  ;;  %1638 = vmatpush3.bf16.msra.mxu1 %v1646_v3 }
  0x10   :  { %1555 = vmatprep.subr.bf16.mxu0 %v1647_v6  ;;  %1631 = vmatprep.subr.bf16.mxu1 %v1647_v6 }
  0x13   :  { %1556 = vmatpush3.bf16.msra.mxu0 %v1647_v6  ;;  %1639 = vmatpush3.bf16.msra.mxu1 %v1647_v6 }
  0x14   :  { %1557 = vmatprep.subr.bf16.mxu0 %v1648_v7  ;;  %1632 = vmatprep.subr.bf16.mxu1 %v1648_v7 }
  0x17   :  { %1558 = vmatpush3.bf16.msra.mxu0 %v1648_v7  ;;  %1640 = vmatpush3.bf16.msra.mxu1 %v1648_v7 }
  0x18   :  { %1559 = vmatprep.subr.bf16.mxu0 %v1649_v8  ;;  %1633 = vmatprep.subr.bf16.mxu1 %v1649_v8 }
  0x1b   :  { %1560 = vmatpush3.bf16.msra.mxu0 %v1649_v8  ;;  %1641 = vmatpush3.bf16.msra.mxu1 %v1649_v8 }
  0x1c   :  { %1561 = vmatprep.subr.bf16.mxu0 %v1650_v9  ;;  %1634 = vmatprep.subr.bf16.mxu1 %v1650_v9 }
  0x1f   :  { %1562 = vmatpush3.bf16.msra.mxu0 %v1650_v9  ;;  %1642 = vmatpush3.bf16.msra.mxu1 %v1650_v9 }
  0x22   :  { %1564 = vmatmul.mubr.bf16.vlgmr.msra.gmra.mrb[0].mxu0 %v1653_v10  ;;  %1596 = vmatmul.mubr.bf16.vlgmr.msra.gmra.mrb[0].mxu1 %v1654_v11 }
  0x23   :  { %1567 = vmatprep.mubr.bf16.mxu0 %v1655_v12  ;;  %1599 = vmatprep.mubr.bf16.mxu1 %v1656_v13 }
  0x2a   :  { %1568 = vmatmul.mubr.bf16.gmra.mrb[4].mxu0 %v1657_v14  ;;  %1600 = vmatmul.mubr.bf16.gmra.mrb[4].mxu1 %v1658_v15 }
  0x2b   :  { %1571 = vmatprep.mubr.bf16.mxu0 %v1659_v16  ;;  %1603 = vmatprep.mubr.bf16.mxu1 %v1660_v17 }
  0x32   :  { %1572 = vmatmul.mubr.bf16.gmra.mrb[8].mxu0 %v1661_v18  ;;  %1604 = vmatmul.mubr.bf16.gmra.mrb[8].mxu1 %v1662_v19 }
  0x33   :  { %1575 = vmatprep.mubr.bf16.mxu0 %v1663_v20  ;;  %1607 = vmatprep.mubr.bf16.mxu1 %v1664_v21 }
  0x3a   :  { %1576 = vmatmul.mubr.bf16.gmra.mrb[12].mxu0 %v1665_v22  ;;  %1608 = vmatmul.mubr.bf16.gmra.mrb[12].mxu1 %v1666_v23 }
  0x3b   :  { %1579 = vmatprep.mubr.bf16.mxu0 %v1667_v24  ;;  %1611 = vmatprep.mubr.bf16.mxu1 %v1668_v25 }
  0x42   :  { %1580 = vmatmul.mubr.bf16.gmra.mrb[16].mxu0 %v1669_v26  ;;  %1612 = vmatmul.mubr.bf16.gmra.mrb[16].mxu1 %v1670_v27 }
  0x43   :  { %1583 = vmatprep.mubr.bf16.mxu0 %v1671_v28  ;;  %1615 = vmatprep.mubr.bf16.mxu1 %v1672_v29 }
  0x4a   :  { %1584 = vmatmul.mubr.bf16.gmra.mrb[20].mxu0 %v1673_v30  ;;  %1616 = vmatmul.mubr.bf16.gmra.mrb[20].mxu1 %v1674_v31 }
  0x4b   :  { %1587 = vmatprep.mubr.bf16.mxu0 %v1675_v32  ;;  %1619 = vmatprep.mubr.bf16.mxu1 %v1676_v33 }
  0x52   :  { %1588 = vmatmul.mubr.bf16.gmra.mrb[24].mxu0 %v1677_v34  ;;  %1620 = vmatmul.mubr.bf16.gmra.mrb[24].mxu1 %v1678_v35 }
  0x53   :  { %1591 = vmatprep.mubr.bf16.mxu0 %v1679_v36  ;;  %1623 = vmatprep.mubr.bf16.mxu1 %v1680_v37 }
  0x5a   :  { %1592 = vmatmul.mubr.bf16.gmra.mrb[28].mxu0 %v1681_v38  ;;  %1624 = vmatmul.mubr.bf16.gmra.mrb[28].mxu1 %v1682_v39 }
  0xf5   :  { %v1565_v41 = vpop.f32.mrb[0].mxu0  ;;  %v1597_v42 = vpop.f32.mrb[0].mxu1 }
  0xf6   :  { %v385_v43 = vadd.f32 %v1565_v41, %v1826_v40  ;;  %v513_v44 = vadd.f32 %v1597_v42, %v1826_v40  ;;  %v376_v45 = vpop.f32.mrb[1].mxu0  ;;  %v504_v46 = vpop.f32.mrb[1].mxu1 }
  0xf7   :  { %v377_v47 = vadd.f32 %v1826_v40, %v376_v45  ;;  %v505_v48 = vadd.f32 %v1826_v40, %v504_v46  ;;  %v1566_v49 = vpop.f32.mrb[2].mxu0  ;;  %v1598_v50 = vpop.f32.mrb[2].mxu1 }
  0xf8   :  { %vm633_vm0 = vcmp.ge.f32.partialorder %v385_v43, 0.0  ;;  %v697_v51 = vmul.f32 0.2, %v385_v43  ;;  %vm665_vm1 = vcmp.ge.f32.partialorder %v513_v44, 0.0  ;;  %v729_v52 = vmul.f32 0.2, %v513_v44 }
  0xf9   :  { %vm631_vm2 = vcmp.ge.f32.partialorder %v377_v47, 0.0  ;;  %v695_v53 = vmul.f32 0.2, %v377_v47  ;;  %vm663_vm3 = vcmp.ge.f32.partialorder %v505_v48, 0.0  ;;  %v727_v54 = vmul.f32 0.2, %v505_v48 }
  0xfa   :  { %v388_v55 = vadd.f32 %v1566_v49, %v1826_v40  ;;  %v516_v56 = vadd.f32 %v1598_v50, %v1826_v40  ;;  %v379_v57 = vpop.f32.mrb[3].mxu0  ;;  %v507_v58 = vpop.f32.mrb[3].mxu1  ;;  %v761_v59 = vsel %vm633_vm0, %v385_v43, %v697_v51  ;;  %v793_v60 = vsel %vm665_vm1, %v513_v44, %v729_v52 }
  0xfb   :  { %v380_v61 = vadd.f32 %v1826_v40, %v379_v57  ;;  %v508_v62 = vadd.f32 %v1826_v40, %v507_v58  ;;  %v759_v3 = vsel %vm631_vm2, %v377_v47, %v695_v53  ;;  %v791_v4 = vsel %vm663_vm3, %v505_v48, %v727_v54 }
  0xfc   :  { %vm634_vm4 = vcmp.ge.f32.partialorder %v388_v55, 0.0  ;;  %v698_v63 = vmul.f32 0.2, %v388_v55  ;;  %vm666_vm5 = vcmp.ge.f32.partialorder %v516_v56, 0.0  ;;  %v730_v0 = vmul.f32 0.2, %v516_v56 }
  0xfd   :  { %vm632_vm6 = vcmp.ge.f32.partialorder %v380_v61, 0.0  ;;  %v696_v1 = vmul.f32 0.2, %v380_v61  ;;  %vm664_vm7 = vcmp.ge.f32.partialorder %v508_v62, 0.0  ;;  %v728_v2 = vmul.f32 0.2, %v508_v62 }
  0xfe   :  { %v762_v5 = vsel %vm634_vm4, %v388_v55, %v698_v63  ;;  %v794_v6 = vsel %vm666_vm5, %v516_v56, %v730_v0  ;;  %v1569_v7 = vpop.f32.mrb[4].mxu0  ;;  %v1601_v8 = vpop.f32.mrb[4].mxu1 }
  0xff   :  { %v1324_v9 = vpack.c.bf16 %v762_v5, %v761_v59  ;;  %v1404_v10 = vpack.c.bf16 %v794_v6, %v793_v60  ;;  %v760_v11 = vsel %vm632_vm6, %v380_v61, %v696_v1  ;;  %v792_v12 = vsel %vm664_vm7, %v508_v62, %v728_v2  ;;  %v392_v13 = vpop.f32.mrb[5].mxu0  ;;  %v520_v14 = vpop.f32.mrb[5].mxu1 }
 0x100   :  { %v1319_v15 = vpack.c.bf16 %v760_v11, %v759_v3  ;;  %v1399_v16 = vpack.c.bf16 %v792_v12, %v791_v4  ;;  %v401_v17 = vadd.f32 %v1569_v7, %v1826_v40  ;;  %v529_v18 = vadd.f32 %v1601_v8, %v1826_v40  ;;  %v1570_v19 = vpop.f32.mrb[6].mxu0  ;;  %v1602_v20 = vpop.f32.mrb[6].mxu1 }
 0x101   :  { %1476 = vst [vmem:[%s2000_s3 + $0x8] sm:$0xff] %v1324_v9   ;;  %1492 = vst [vmem:[%s2000_s3 + $0x88] sm:$0xff] %v1404_v10   ;;  %v393_v21 = vadd.f32 %v1826_v40, %v392_v13  ;;  %v521_v22 = vadd.f32 %v1826_v40, %v520_v14  ;;  %v404_v23 = vadd.f32 %v1570_v19, %v1826_v40  ;;  %v395_v25 = vpop.f32.mrb[7].mxu0  ;;  %v523_v26 = vpop.f32.mrb[7].mxu1 }
 0x102   :  { %v532_v24 = vadd.f32 %v1602_v20, %v1826_v40  ;;  %1320 = vst [vmem:[%s2000_s3] sm:$0xff] %v1319_v15   ;;  %1491 = vst [vmem:[%s2000_s3 + $0x80] sm:$0xff] %v1399_v16   ;;  %vm637_vm8 = vcmp.ge.f32.partialorder %v401_v17, 0.0  ;;  %v701_v27 = vmul.f32 0.2, %v401_v17  ;;  %vm669_vm9 = vcmp.ge.f32.partialorder %v529_v18, 0.0 }
 0x103   :  { %v733_v28 = vmul.f32 0.2, %v529_v18  ;;  %vm635_vm10 = vcmp.ge.f32.partialorder %v393_v21, 0.0  ;;  %v699_v29 = vmul.f32 0.2, %v393_v21  ;;  %vm667_vm11 = vcmp.ge.f32.partialorder %v521_v22, 0.0 }
 0x104   :  { %v731_v30 = vmul.f32 0.2, %v521_v22  ;;  %v765_v31 = vsel %vm637_vm8, %v401_v17, %v701_v27  ;;  %vm638_vm12 = vcmp.ge.f32.partialorder %v404_v23, 0.0  ;;  %v702_v33 = vmul.f32 0.2, %v404_v23 }
 0x105   :  { %v797_v32 = vsel %vm669_vm9, %v529_v18, %v733_v28  ;;  %v763_v34 = vsel %vm635_vm10, %v393_v21, %v699_v29  ;;  %vm670_vm13 = vcmp.ge.f32.partialorder %v532_v24, 0.0  ;;  %v734_v36 = vmul.f32 0.2, %v532_v24  ;;  %v1573_v37 = vpop.f32.mrb[8].mxu0  ;;  %v1605_v38 = vpop.f32.mrb[8].mxu1 }
 0x106   :  { %v795_v35 = vsel %vm667_vm11, %v521_v22, %v731_v30  ;;  %v766_v39 = vsel %vm638_vm12, %v404_v23, %v702_v33  ;;  %v396_v41 = vadd.f32 %v1826_v40, %v395_v25  ;;  %v524_v42 = vadd.f32 %v1826_v40, %v523_v26  ;;  %v408_v44 = vpop.f32.mrb[9].mxu0  ;;  %v536_v45 = vpop.f32.mrb[9].mxu1 }
 0x107   :  { %v417_v43 = vadd.f32 %v1573_v37, %v1826_v40  ;;  %v1334_v46 = vpack.c.bf16 %v766_v39, %v765_v31  ;;  %v798_v47 = vsel %vm670_vm13, %v532_v24, %v734_v36  ;;  %v545_v48 = vadd.f32 %v1605_v38, %v1826_v40  ;;  %v1574_v50 = vpop.f32.mrb[10].mxu0  ;;  %v1606_v51 = vpop.f32.mrb[10].mxu1 }
 0x108   :  { %v409_v49 = vadd.f32 %v1826_v40, %v408_v44  ;;  %v1414_v52 = vpack.c.bf16 %v798_v47, %v797_v32  ;;  %vm636_vm14 = vcmp.ge.f32.partialorder %v396_v41, 0.0  ;;  %v700_v53 = vmul.f32 0.2, %v396_v41  ;;  %v411_v54 = vpop.f32.mrb[11].mxu0  ;;  %v539_v55 = vpop.f32.mrb[11].mxu1 }
 0x109   :  { %vm668_vm15 = vcmp.ge.f32.partialorder %v524_v42, 0.0  ;;  %1478 = vst [vmem:[%s2000_s3 + $0x18] sm:$0xff] %v1334_v46   ;;  %v732_v56 = vmul.f32 0.2, %v524_v42  ;;  %vm641_vm0 = vcmp.ge.f32.partialorder %v417_v43, 0.0  ;;  %vm673_vm1 = vcmp.ge.f32.partialorder %v545_v48, 0.0 }
 0x10a   :  { %v705_v57 = vmul.f32 0.2, %v417_v43  ;;  %1494 = vst [vmem:[%s2000_s3 + $0x98] sm:$0xff] %v1414_v52   ;;  %v764_v58 = vsel %vm636_vm14, %v396_v41, %v700_v53  ;;  %v737_v59 = vmul.f32 0.2, %v545_v48  ;;  %vm639_vm2 = vcmp.ge.f32.partialorder %v409_v49, 0.0 }
 0x10b   :  { %v703_v60 = vmul.f32 0.2, %v409_v49  ;;  %v1329_v61 = vpack.c.bf16 %v764_v58, %v763_v34  ;;  %v796_v62 = vsel %vm668_vm15, %v524_v42, %v732_v56  ;;  %v537_v0 = vadd.f32 %v1826_v40, %v536_v45 }
 0x10c   :  { %v769_v63 = vsel %vm641_vm0, %v417_v43, %v705_v57  ;;  %v1409_v1 = vpack.c.bf16 %v796_v62, %v795_v35  ;;  %v801_v2 = vsel %vm673_vm1, %v545_v48, %v737_v59  ;;  %v420_v4 = vadd.f32 %v1574_v50, %v1826_v40 }
 0x10d   :  { %v767_v3 = vsel %vm639_vm2, %v409_v49, %v703_v60  ;;  %1477 = vst [vmem:[%s2000_s3 + $0x10] sm:$0xff] %v1329_v61   ;;  %vm671_vm3 = vcmp.ge.f32.partialorder %v537_v0, 0.0  ;;  %v735_v5 = vmul.f32 0.2, %v537_v0  ;;  %v548_v6 = vadd.f32 %v1606_v51, %v1826_v40  ;;  %v1577_v8 = vpop.f32.mrb[12].mxu0  ;;  %v1609_v9 = vpop.f32.mrb[12].mxu1 }
 0x10e   :  { %v412_v7 = vadd.f32 %v1826_v40, %v411_v54  ;;  %1493 = vst [vmem:[%s2000_s3 + $0x90] sm:$0xff] %v1409_v1   ;;  %vm642_vm4 = vcmp.ge.f32.partialorder %v420_v4, 0.0  ;;  %v706_v10 = vmul.f32 0.2, %v420_v4  ;;  %v540_v11 = vadd.f32 %v1826_v40, %v539_v55  ;;  %v424_v13 = vpop.f32.mrb[13].mxu0  ;;  %v552_v14 = vpop.f32.mrb[13].mxu1 }
 0x10f   :  { %v433_v12 = vadd.f32 %v1577_v8, %v1826_v40  ;;  %v799_v15 = vsel %vm671_vm3, %v537_v0, %v735_v5  ;;  %vm674_vm5 = vcmp.ge.f32.partialorder %v548_v6, 0.0  ;;  %v738_v16 = vmul.f32 0.2, %v548_v6  ;;  %v1578_v17 = vpop.f32.mrb[14].mxu0  ;;  %v1610_v18 = vpop.f32.mrb[14].mxu1 }
 0x110   :  { %vm640_vm6 = vcmp.ge.f32.partialorder %v412_v7, 0.0  ;;  %v770_v19 = vsel %vm642_vm4, %v420_v4, %v706_v10  ;;  %v704_v20 = vmul.f32 0.2, %v412_v7  ;;  %vm672_vm7 = vcmp.ge.f32.partialorder %v540_v11, 0.0  ;;  %v427_v22 = vpop.f32.mrb[15].mxu0  ;;  %v555_v26 = vpop.f32.mrb[15].mxu1 }
 0x111   :  { %v736_v21 = vmul.f32 0.2, %v540_v11  ;;  %v1344_v23 = vpack.c.bf16 %v770_v19, %v769_v63  ;;  %v802_v24 = vsel %vm674_vm5, %v548_v6, %v738_v16  ;;  %vm645_vm8 = vcmp.ge.f32.partialorder %v433_v12, 0.0 }
 0x112   :  { %v709_v25 = vmul.f32 0.2, %v433_v12  ;;  %v1424_v27 = vpack.c.bf16 %v802_v24, %v801_v2  ;;  %v768_v28 = vsel %vm640_vm6, %v412_v7, %v704_v20  ;;  %v561_v30 = vadd.f32 %v1609_v9, %v1826_v40 }
 0x113   :  { %v800_v29 = vsel %vm672_vm7, %v540_v11, %v736_v21  ;;  %1480 = vst [vmem:[%s2000_s3 + $0x28] sm:$0xff] %v1344_v23   ;;  %v1339_v31 = vpack.c.bf16 %v768_v28, %v767_v3  ;;  %v425_v34 = vadd.f32 %v1826_v40, %v424_v13  ;;  %v553_v36 = vadd.f32 %v1826_v40, %v552_v14 }
 0x114   :  { %v1419_v32 = vpack.c.bf16 %v800_v29, %v799_v15  ;;  %v773_v33 = vsel %vm645_vm8, %v433_v12, %v709_v25  ;;  %1496 = vst [vmem:[%s2000_s3 + $0xa8] sm:$0xff] %v1424_v27   ;;  %vm677_vm9 = vcmp.ge.f32.partialorder %v561_v30, 0.0  ;;  %v741_v35 = vmul.f32 0.2, %v561_v30 }
 0x115   :  { %v436_v37 = vadd.f32 %v1578_v17, %v1826_v40  ;;  %1479 = vst [vmem:[%s2000_s3 + $0x20] sm:$0xff] %v1339_v31   ;;  %vm643_vm10 = vcmp.ge.f32.partialorder %v425_v34, 0.0  ;;  %v707_v38 = vmul.f32 0.2, %v425_v34  ;;  %v564_v39 = vadd.f32 %v1610_v18, %v1826_v40  ;;  %v1581_v42 = vpop.f32.mrb[16].mxu0  ;;  %v1613_v43 = vpop.f32.mrb[16].mxu1 }
 0x116   :  { %1495 = vst [vmem:[%s2000_s3 + $0xa0] sm:$0xff] %v1419_v32   ;;  %v428_v41 = vadd.f32 %v1826_v40, %v427_v22  ;;  %v805_v44 = vsel %vm677_vm9, %v561_v30, %v741_v35  ;;  %vm675_vm11 = vcmp.ge.f32.partialorder %v553_v36, 0.0  ;;  %v739_v45 = vmul.f32 0.2, %v553_v36  ;;  %v440_v46 = vpop.f32.mrb[17].mxu0  ;;  %v568_v47 = vpop.f32.mrb[17].mxu1 }
 0x117   :  { %vm646_vm12 = vcmp.ge.f32.partialorder %v436_v37, 0.0  ;;  %v771_v48 = vsel %vm643_vm10, %v425_v34, %v707_v38  ;;  %v710_v49 = vmul.f32 0.2, %v436_v37  ;;  %vm678_vm13 = vcmp.ge.f32.partialorder %v564_v39, 0.0  ;;  %v1582_v51 = vpop.f32.mrb[18].mxu0  ;;  %v1614_v55 = vpop.f32.mrb[18].mxu1 }
 0x118   :  { %v742_v50 = vmul.f32 0.2, %v564_v39  ;;  %v803_v52 = vsel %vm675_vm11, %v553_v36, %v739_v45  ;;  %vm644_vm14 = vcmp.ge.f32.partialorder %v428_v41, 0.0  ;;  %v708_v53 = vmul.f32 0.2, %v428_v41  ;;  %v443_v56 = vpop.f32.mrb[19].mxu0 }
 0x119   :  { %v556_v54 = vadd.f32 %v1826_v40, %v555_v26  ;;  %v774_v57 = vsel %vm646_vm12, %v436_v37, %v710_v49  ;;  %v449_v59 = vadd.f32 %v1581_v42, %v1826_v40  ;;  %v577_v60 = vadd.f32 %v1613_v43, %v1826_v40  ;;  %v571_v61 = vpop.f32.mrb[19].mxu1 }
 0x11a   :  { %v806_v58 = vsel %vm678_vm13, %v564_v39, %v742_v50  ;;  %v1354_v62 = vpack.c.bf16 %v774_v57, %v773_v33  ;;  %v772_v0 = vsel %vm644_vm14, %v428_v41, %v708_v53  ;;  %v441_v5 = vadd.f32 %v1826_v40, %v440_v46 }
 0x11b   :  { %v1434_v63 = vpack.c.bf16 %v806_v58, %v805_v44  ;;  %vm676_vm15 = vcmp.ge.f32.partialorder %v556_v54, 0.0  ;;  %v1349_v1 = vpack.c.bf16 %v772_v0, %v771_v48  ;;  %v740_v2 = vmul.f32 0.2, %v556_v54 }
 0x11c   :  { %vm649_vm0 = vcmp.ge.f32.partialorder %v449_v59, 0.0  ;;  %v713_v3 = vmul.f32 0.2, %v449_v59  ;;  %1482 = vst [vmem:[%s2000_s3 + $0x38] sm:$0xff] %v1354_v62   ;;  %vm681_vm1 = vcmp.ge.f32.partialorder %v577_v60, 0.0  ;;  %v569_v6 = vadd.f32 %v1826_v40, %v568_v47 }
 0x11d   :  { %1498 = vst [vmem:[%s2000_s3 + $0xb8] sm:$0xff] %v1434_v63   ;;  %v745_v4 = vmul.f32 0.2, %v577_v60  ;;  %1481 = vst [vmem:[%s2000_s3 + $0x30] sm:$0xff] %v1349_v1   ;;  %v804_v7 = vsel %vm676_vm15, %v556_v54, %v740_v2  ;;  %v452_v9 = vadd.f32 %v1582_v51, %v1826_v40  ;;  %v580_v10 = vadd.f32 %v1614_v55, %v1826_v40  ;;  %v1585_v11 = vpop.f32.mrb[20].mxu0  ;;  %v1617_v12 = vpop.f32.mrb[20].mxu1 }
 0x11e   :  { %v777_v8 = vsel %vm649_vm0, %v449_v59, %v713_v3  ;;  %v1429_v13 = vpack.c.bf16 %v804_v7, %v803_v52  ;;  %vm647_vm2 = vcmp.ge.f32.partialorder %v441_v5, 0.0  ;;  %v711_v15 = vmul.f32 0.2, %v441_v5  ;;  %v456_v16 = vpop.f32.mrb[21].mxu0  ;;  %v584_v17 = vpop.f32.mrb[21].mxu1 }
 0x11f   :  { %v809_v14 = vsel %vm681_vm1, %v577_v60, %v745_v4  ;;  %vm679_vm3 = vcmp.ge.f32.partialorder %v569_v6, 0.0  ;;  %v743_v18 = vmul.f32 0.2, %v569_v6  ;;  %vm650_vm4 = vcmp.ge.f32.partialorder %v452_v9, 0.0  ;;  %v1586_v23 = vpop.f32.mrb[22].mxu0  ;;  %v1618_v24 = vpop.f32.mrb[22].mxu1 }
 0x120   :  { %v714_v19 = vmul.f32 0.2, %v452_v9  ;;  %1497 = vst [vmem:[%s2000_s3 + $0xb0] sm:$0xff] %v1429_v13   ;;  %v775_v20 = vsel %vm647_vm2, %v441_v5, %v711_v15  ;;  %vm682_vm5 = vcmp.ge.f32.partialorder %v580_v10, 0.0  ;;  %v746_v21 = vmul.f32 0.2, %v580_v10 }
 0x121   :  { %v444_v22 = vadd.f32 %v1826_v40, %v443_v56  ;;  %v807_v25 = vsel %vm679_vm3, %v569_v6, %v743_v18  ;;  %v572_v27 = vadd.f32 %v1826_v40, %v571_v61  ;;  %v465_v28 = vadd.f32 %v1585_v11, %v1826_v40  ;;  %v459_v29 = vpop.f32.mrb[23].mxu0  ;;  %v587_v30 = vpop.f32.mrb[23].mxu1 }
 0x122   :  { %v778_v26 = vsel %vm650_vm4, %v452_v9, %v714_v19  ;;  %v810_v32 = vsel %vm682_vm5, %v580_v10, %v746_v21  ;;  %v593_v38 = vadd.f32 %v1617_v12, %v1826_v40  ;;  %v457_v39 = vadd.f32 %v1826_v40, %v456_v16 }
 0x123   :  { %v1364_v31 = vpack.c.bf16 %v778_v26, %v777_v8  ;;  %vm648_vm6 = vcmp.ge.f32.partialorder %v444_v22, 0.0  ;;  %v712_v33 = vmul.f32 0.2, %v444_v22  ;;  %v1444_v34 = vpack.c.bf16 %v810_v32, %v809_v14 }
 0x124   :  { %vm680_vm7 = vcmp.ge.f32.partialorder %v572_v27, 0.0  ;;  %v744_v35 = vmul.f32 0.2, %v572_v27  ;;  %vm653_vm8 = vcmp.ge.f32.partialorder %v465_v28, 0.0  ;;  %v717_v37 = vmul.f32 0.2, %v465_v28 }
 0x125   :  { %1484 = vst [vmem:[%s2000_s3 + $0x48] sm:$0xff] %v1364_v31   ;;  %v776_v36 = vsel %vm648_vm6, %v444_v22, %v712_v33  ;;  %1500 = vst [vmem:[%s2000_s3 + $0xc8] sm:$0xff] %v1444_v34   ;;  %v585_v43 = vadd.f32 %v1826_v40, %v584_v17  ;;  %v468_v44 = vadd.f32 %v1586_v23, %v1826_v40  ;;  %v1589_v45 = vpop.f32.mrb[24].mxu0  ;;  %v1621_v46 = vpop.f32.mrb[24].mxu1  ;;  %vm685_vm9 = vcmp.ge.f32.partialorder %v593_v38, 0.0 }
 0x126   :  { %v1359_v41 = vpack.c.bf16 %v776_v36, %v775_v20  ;;  %v808_v42 = vsel %vm680_vm7, %v572_v27, %v744_v35  ;;  %v749_v48 = vmul.f32 0.2, %v593_v38  ;;  %v472_v49 = vpop.f32.mrb[25].mxu0  ;;  %v600_v50 = vpop.f32.mrb[25].mxu1  ;;  %v781_v51 = vsel %vm653_vm8, %v465_v28, %v717_v37 }
 0x127   :  { %v1439_v47 = vpack.c.bf16 %v808_v42, %v807_v25  ;;  %vm651_vm10 = vcmp.ge.f32.partialorder %v457_v39, 0.0  ;;  %v715_v52 = vmul.f32 0.2, %v457_v39  ;;  %v747_v53 = vmul.f32 0.2, %v585_v43  ;;  %v1590_v56 = vpop.f32.mrb[26].mxu0 }
 0x128   :  { %1483 = vst [vmem:[%s2000_s3 + $0x40] sm:$0xff] %v1359_v41   ;;  %vm683_vm11 = vcmp.ge.f32.partialorder %v585_v43, 0.0  ;;  %vm654_vm12 = vcmp.ge.f32.partialorder %v468_v44, 0.0  ;;  %v718_v54 = vmul.f32 0.2, %v468_v44  ;;  %v596_v55 = vadd.f32 %v1618_v24, %v1826_v40  ;;  %v1622_v57 = vpop.f32.mrb[26].mxu1 }
 0x129   :  { %1499 = vst [vmem:[%s2000_s3 + $0xc0] sm:$0xff] %v1439_v47   ;;  %v813_v58 = vsel %vm685_vm9, %v593_v38, %v749_v48  ;;  %v779_v59 = vsel %vm651_vm10, %v457_v39, %v715_v52  ;;  %v460_v60 = vadd.f32 %v1826_v40, %v459_v29  ;;  %v588_v61 = vadd.f32 %v1826_v40, %v587_v30  ;;  %v475_v62 = vpop.f32.mrb[27].mxu0  ;;  %v603_v63 = vpop.f32.mrb[27].mxu1 }
 0x12a   :  { %v782_v0 = vsel %vm654_vm12, %v468_v44, %v718_v54  ;;  %vm686_vm13 = vcmp.ge.f32.partialorder %v596_v55, 0.0  ;;  %v750_v1 = vmul.f32 0.2, %v596_v55  ;;  %v481_v2 = vadd.f32 %v1589_v45, %v1826_v40 }
 0x12b   :  { %v1374_v3 = vpack.c.bf16 %v782_v0, %v781_v51  ;;  %vm652_vm14 = vcmp.ge.f32.partialorder %v460_v60, 0.0  ;;  %v716_v4 = vmul.f32 0.2, %v460_v60  ;;  %vm684_vm15 = vcmp.ge.f32.partialorder %v588_v61, 0.0 }
 0x12c   :  { %v814_v5 = vsel %vm686_vm13, %v596_v55, %v750_v1  ;;  %v748_v6 = vmul.f32 0.2, %v588_v61  ;;  %vm657_vm0 = vcmp.ge.f32.partialorder %v481_v2, 0.0  ;;  %v721_v7 = vmul.f32 0.2, %v481_v2 }
 0x12d   :  { %1486 = vst [vmem:[%s2000_s3 + $0x58] sm:$0xff] %v1374_v3   ;;  %v1454_v8 = vpack.c.bf16 %v814_v5, %v813_v58  ;;  %v780_v9 = vsel %vm652_vm14, %v460_v60, %v716_v4  ;;  %v609_v10 = vadd.f32 %v1621_v46, %v1826_v40  ;;  %v473_v11 = vadd.f32 %v1826_v40, %v472_v49  ;;  %v1593_v12 = vpop.f32.mrb[28].mxu0  ;;  %v1625_v13 = vpop.f32.mrb[28].mxu1 }
 0x12e   :  { %v811_v14 = vsel %vm683_vm11, %v585_v43, %v747_v53  ;;  %v1369_v15 = vpack.c.bf16 %v780_v9, %v779_v59  ;;  %v812_v16 = vsel %vm684_vm15, %v588_v61, %v748_v6  ;;  %v601_v17 = vadd.f32 %v1826_v40, %v600_v50  ;;  %v488_v18 = vpop.f32.mrb[29].mxu0  ;;  %v616_v19 = vpop.f32.mrb[29].mxu1 }
 0x12f   :  { %1502 = vst [vmem:[%s2000_s3 + $0xd8] sm:$0xff] %v1454_v8   ;;  %v1449_v20 = vpack.c.bf16 %v812_v16, %v811_v14  ;;  %vm689_vm1 = vcmp.ge.f32.partialorder %v609_v10, 0.0  ;;  %v753_v21 = vmul.f32 0.2, %v609_v10  ;;  %vm655_vm2 = vcmp.ge.f32.partialorder %v473_v11, 0.0  ;;  %v1594_v22 = vpop.f32.mrb[30].mxu0 }
 0x130   :  { %v1626_v23 = vpop.f32.mrb[30].mxu1  ;;  %1485 = vst [vmem:[%s2000_s3 + $0x50] sm:$0xff] %v1369_v15   ;;  %v785_v24 = vsel %vm657_vm0, %v481_v2, %v721_v7  ;;  %v719_v25 = vmul.f32 0.2, %v473_v11  ;;  %vm687_vm3 = vcmp.ge.f32.partialorder %v601_v17, 0.0  ;;  %v484_v26 = vadd.f32 %v1590_v56, %v1826_v40  ;;  %v491_v27 = vpop.f32.mrb[31].mxu0 }
 0x131   :  { %1501 = vst [vmem:[%s2000_s3 + $0xd0] sm:$0xff] %v1449_v20   ;;  %v751_v28 = vmul.f32 0.2, %v601_v17  ;;  %v612_v29 = vadd.f32 %v1622_v57, %v1826_v40  ;;  %v476_v30 = vadd.f32 %v1826_v40, %v475_v62  ;;  %v604_v31 = vadd.f32 %v1826_v40, %v603_v63  ;;  %v619_v32 = vpop.f32.mrb[31].mxu1 }
 0x132   :  { %v817_v33 = vsel %vm689_vm1, %v609_v10, %v753_v21  ;;  %v783_v34 = vsel %vm655_vm2, %v473_v11, %v719_v25  ;;  %vm658_vm4 = vcmp.ge.f32.partialorder %v484_v26, 0.0  ;;  %v722_v35 = vmul.f32 0.2, %v484_v26 }
 0x133   :  { %vm690_vm5 = vcmp.ge.f32.partialorder %v612_v29, 0.0  ;;  %v754_v36 = vmul.f32 0.2, %v612_v29  ;;  %vm656_vm6 = vcmp.ge.f32.partialorder %v476_v30, 0.0  ;;  %v720_v37 = vmul.f32 0.2, %v476_v30 }
 0x134   :  { %v786_v38 = vsel %vm658_vm4, %v484_v26, %v722_v35  ;;  %vm688_vm7 = vcmp.ge.f32.partialorder %v604_v31, 0.0  ;;  %v752_v39 = vmul.f32 0.2, %v604_v31  ;;  %v497_v41 = vadd.f32 %v1593_v12, %v1826_v40 }
 0x135   :  { %v1384_v42 = vpack.c.bf16 %v786_v38, %v785_v24  ;;  %v818_v43 = vsel %vm690_vm5, %v612_v29, %v754_v36  ;;  %v784_v44 = vsel %vm656_vm6, %v476_v30, %v720_v37  ;;  %v625_v45 = vadd.f32 %v1625_v13, %v1826_v40 }
 0x136   :  { %v815_v46 = vsel %vm687_vm3, %v601_v17, %v751_v28  ;;  %v1464_v47 = vpack.c.bf16 %v818_v43, %v817_v33  ;;  %v1379_v48 = vpack.c.bf16 %v784_v44, %v783_v34  ;;  %v816_v49 = vsel %vm688_vm7, %v604_v31, %v752_v39 }
 0x137   :  { %1488 = vst [vmem:[%s2000_s3 + $0x68] sm:$0xff] %v1384_v42   ;;  %v1459_v50 = vpack.c.bf16 %v816_v49, %v815_v46  ;;  %vm661_vm8 = vcmp.ge.f32.partialorder %v497_v41, 0.0  ;;  %v725_v51 = vmul.f32 0.2, %v497_v41  ;;  %v757_v52 = vmul.f32 0.2, %v625_v45 }
 0x138   :  { %1504 = vst [vmem:[%s2000_s3 + $0xe8] sm:$0xff] %v1464_v47   ;;  %1487 = vst [vmem:[%s2000_s3 + $0x60] sm:$0xff] %v1379_v48   ;;  %v489_v53 = vadd.f32 %v1826_v40, %v488_v18  ;;  %v617_v54 = vadd.f32 %v1826_v40, %v616_v19  ;;  %v500_v55 = vadd.f32 %v1594_v22, %v1826_v40  ;;  %vm693_vm9 = vcmp.ge.f32.partialorder %v625_v45, 0.0 }
 0x139   :  { %v628_v56 = vadd.f32 %v1626_v23, %v1826_v40  ;;  %1503 = vst [vmem:[%s2000_s3 + $0xe0] sm:$0xff] %v1459_v50   ;;  %v492_v57 = vadd.f32 %v1826_v40, %v491_v27  ;;  %v620_v58 = vadd.f32 %v1826_v40, %v619_v32  ;;  %v789_v59 = vsel %vm661_vm8, %v497_v41, %v725_v51 }
 0x13a   :  { %vm659_vm10 = vcmp.ge.f32.partialorder %v489_v53, 0.0  ;;  %v723_v60 = vmul.f32 0.2, %v489_v53  ;;  %v755_v61 = vmul.f32 0.2, %v617_v54  ;;  %vm662_vm11 = vcmp.ge.f32.partialorder %v500_v55, 0.0 }
 0x13b   :  { %v726_v62 = vmul.f32 0.2, %v500_v55  ;;  %vm694_vm12 = vcmp.ge.f32.partialorder %v628_v56, 0.0  ;;  %v758_v63 = vmul.f32 0.2, %v628_v56  ;;  %v821_v0 = vsel %vm693_vm9, %v625_v45, %v757_v52 }
 0x13c   :  { %vm691_vm13 = vcmp.ge.f32.partialorder %v617_v54, 0.0  ;;  %vm660_vm14 = vcmp.ge.f32.partialorder %v492_v57, 0.0  ;;  %v724_v1 = vmul.f32 0.2, %v492_v57  ;;  %vm692_vm15 = vcmp.ge.f32.partialorder %v620_v58, 0.0 }
 0x13d   :  { %v790_v2 = vsel %vm662_vm11, %v500_v55, %v726_v62  ;;  %v822_v3 = vsel %vm694_vm12, %v628_v56, %v758_v63  ;;  %v756_v4 = vmul.f32 0.2, %v620_v58  ;;  %v787_v5 = vsel %vm659_vm10, %v489_v53, %v723_v60 }
 0x13e   :  { %v1394_v6 = vpack.c.bf16 %v790_v2, %v789_v59  ;;  %v1474_v7 = vpack.c.bf16 %v822_v3, %v821_v0  ;;  %v788_v40 = vsel %vm660_vm14, %v492_v57, %v724_v1  ;;  %v819_v8 = vsel %vm691_vm13, %v617_v54, %v755_v61 }
 0x13f   :  { %v1389_v9 = vpack.c.bf16 %v788_v40, %v787_v5  ;;  %v820_v10 = vsel %vm692_vm15, %v620_v58, %v756_v4 }
 0x140   :  { %1490 = vst [vmem:[%s2000_s3 + $0x78] sm:$0xff] %v1394_v6   ;;  %1506 = vst [vmem:[%s2000_s3 + $0xf8] sm:$0xff] %v1474_v7   ;;  %v1469_v11 = vpack.c.bf16 %v820_v10, %v819_v8 }
 0x141   :  { %1489 = vst [vmem:[%s2000_s3 + $0x70] sm:$0xff] %v1389_v9  }
 0x142   :  { %1505 = vst [vmem:[%s2000_s3 + $0xf0] sm:$0xff] %v1469_v11  }

// kernel: forward.7
= control target key start
LH: loop header
LB: loop body
LE: loop exit
PB: predicated region body
PF: predicated region fallthrough
CT: control target
= control target key end

     0   :  { %s868_s1 = inlined_call_operand.vmem [shape: bf16[256,128], index: 1, kind: input, shape index: {}]   ;;  %s869_s0 = inlined_call_operand.vmem [shape: bf16[128,256], index: 0, kind: input, shape index: {}]   ;;  %s870_s2 = inlined_call_operand.vmem [shape: f32[1,128], index: 2, kind: input, shape index: {}]   ;;  %s871_s3 = inlined_call_operand.vmem [shape: bf16[128,128], index: 3, kind: output, shape index: {}]  }
   0x1   :  { %v667_v0 = vld [vmem:[%s868_s1 + $0x40] sm:$0xff]   ;;  %v669_v2 = vld [vmem:[%s868_s1 + $0x48] sm:$0xff]   ;;  %v671_v4 = vld [vmem:[%s868_s1 + $0x50] sm:$0xff]  }
   0x2   :  { %v668_v1 = vld [vmem:[%s868_s1] sm:$0xff]   ;;  %587 = vmatprep.subr.bf16.mxu0 %v667_v0  ;;  %651 = vmatprep.subr.bf16.mxu1 %v667_v0  ;;  %v670_v3 = vld [vmem:[%s868_s1 + $0x8] sm:$0xff]   ;;  %v672_v5 = vld [vmem:[%s868_s1 + $0x10] sm:$0xff]  }
   0x3   :  { %588 = vmatpush3.bf16.msra.mxu0 %v668_v1  ;;  %659 = vmatpush3.bf16.msra.mxu1 %v668_v1  ;;  %v673_v6 = vld [vmem:[%s868_s1 + $0x58] sm:$0xff]   ;;  %v675_v8 = vld [vmem:[%s868_s1 + $0x60] sm:$0xff]   ;;  %v677_v10 = vld [vmem:[%s868_s1 + $0x68] sm:$0xff]  }
   0x4   :  { %589 = vmatprep.subr.bf16.mxu0 %v669_v2  ;;  %652 = vmatprep.subr.bf16.mxu1 %v669_v2  ;;  %v674_v7 = vld [vmem:[%s868_s1 + $0x18] sm:$0xff]   ;;  %v676_v9 = vld [vmem:[%s868_s1 + $0x20] sm:$0xff]   ;;  %v678_v13 = vld [vmem:[%s868_s1 + $0x28] sm:$0xff]  }
   0x5   :  { %v685_v11 = vld [vmem:[%s869_s0 + $0x4] ss:$8 sps:$4 sm:$0xff]   ;;  %v679_v14 = vld [vmem:[%s868_s1 + $0x70] sm:$0xff]   ;;  %v681_v16 = vld [vmem:[%s868_s1 + $0x78] sm:$0xff]  }
   0x6   :  { %v688_v12 = vld [vmem:[%s869_s0 + $0x44] ss:$8 sps:$4 sm:$0xff]   ;;  %278 = vmatprep.mubr.bf16.mxu0 %v685_v11  ;;  %v680_v15 = vld [vmem:[%s868_s1 + $0x30] sm:$0xff]   ;;  %v682_v17 = vld [vmem:[%s868_s1 + $0x38] sm:$0xff]  }
   0x7   :  { %590 = vmatpush3.bf16.msra.mxu0 %v670_v3  ;;  %660 = vmatpush3.bf16.msra.mxu1 %v670_v3  ;;  %v683_v18 = vld [vmem:[%s869_s0] ss:$8 sps:$4 sm:$0xff]   ;;  %v689_v20 = vld [vmem:[%s869_s0 + $0x14] ss:$8 sps:$4 sm:$0xff]   ;;  %v693_v22 = vld [vmem:[%s869_s0 + $0x10] ss:$8 sps:$4 sm:$0xff]  }
   0x8   :  { %591 = vmatprep.subr.bf16.mxu0 %v671_v4  ;;  %653 = vmatprep.subr.bf16.mxu1 %v671_v4  ;;  %v686_v19 = vld [vmem:[%s869_s0 + $0x40] ss:$8 sps:$4 sm:$0xff]   ;;  %v691_v21 = vld [vmem:[%s869_s0 + $0x54] ss:$8 sps:$4 sm:$0xff]   ;;  %v694_v23 = vld [vmem:[%s869_s0 + $0x50] ss:$8 sps:$4 sm:$0xff]  }
   0x9   :  { %310 = vmatprep.mubr.bf16.mxu1 %v688_v12  ;;  %v695_v24 = vld [vmem:[%s869_s0 + $0x24] ss:$8 sps:$4 sm:$0xff]   ;;  %v699_v26 = vld [vmem:[%s869_s0 + $0x20] ss:$8 sps:$4 sm:$0xff]   ;;  %v701_v28 = vld [vmem:[%s869_s0 + $0x34] ss:$8 sps:$4 sm:$0xff]  }
   0xa   :  { %v697_v25 = vld [vmem:[%s869_s0 + $0x64] ss:$8 sps:$4 sm:$0xff]   ;;  %v700_v27 = vld [vmem:[%s869_s0 + $0x60] ss:$8 sps:$4 sm:$0xff]   ;;  %v703_v29 = vld [vmem:[%s869_s0 + $0x74] ss:$8 sps:$4 sm:$0xff]  }
   0xb   :  { %592 = vmatpush3.bf16.msra.mxu0 %v672_v5  ;;  %661 = vmatpush3.bf16.msra.mxu1 %v672_v5  ;;  %v705_v30 = vld [vmem:[%s869_s0 + $0x30] ss:$8 sps:$4 sm:$0xff]   ;;  %v826_v34 = vld [vmem:[%s870_s2] ss:$0 sm:$0xff] }
   0xc   :  { %593 = vmatprep.subr.bf16.mxu0 %v673_v6  ;;  %654 = vmatprep.subr.bf16.mxu1 %v673_v6  ;;  %v706_v31 = vld [vmem:[%s869_s0 + $0x70] ss:$8 sps:$4 sm:$0xff]  }
   0xf   :  { %594 = vmatpush3.bf16.msra.mxu0 %v674_v7  ;;  %662 = vmatpush3.bf16.msra.mxu1 %v674_v7 }
  0x10   :  { %595 = vmatprep.subr.bf16.mxu0 %v675_v8  ;;  %655 = vmatprep.subr.bf16.mxu1 %v675_v8 }
  0x13   :  { %596 = vmatpush3.bf16.msra.mxu0 %v676_v9  ;;  %663 = vmatpush3.bf16.msra.mxu1 %v676_v9 }
  0x14   :  { %597 = vmatprep.subr.bf16.mxu0 %v677_v10  ;;  %656 = vmatprep.subr.bf16.mxu1 %v677_v10 }
  0x17   :  { %598 = vmatpush3.bf16.msra.mxu0 %v678_v13  ;;  %664 = vmatpush3.bf16.msra.mxu1 %v678_v13 }
  0x18   :  { %599 = vmatprep.subr.bf16.mxu0 %v679_v14  ;;  %657 = vmatprep.subr.bf16.mxu1 %v679_v14 }
  0x1b   :  { %600 = vmatpush3.bf16.msra.mxu0 %v680_v15  ;;  %665 = vmatpush3.bf16.msra.mxu1 %v680_v15 }
  0x1c   :  { %601 = vmatprep.subr.bf16.mxu0 %v681_v16  ;;  %658 = vmatprep.subr.bf16.mxu1 %v681_v16 }
  0x1f   :  { %602 = vmatpush3.bf16.msra.mxu0 %v682_v17  ;;  %666 = vmatpush3.bf16.msra.mxu1 %v682_v17 }
  0x22   :  { %279 = vmatmul.mubr.bf16.vlgmr.msra.gmra.mrb[0].mxu0 %v683_v18  ;;  %311 = vmatmul.mubr.bf16.vlgmr.msra.gmra.mrb[0].mxu1 %v686_v19 }
  0x23   :  { %286 = vmatprep.mubr.bf16.mxu0 %v689_v20  ;;  %318 = vmatprep.mubr.bf16.mxu1 %v691_v21 }
  0x2a   :  { %287 = vmatmul.mubr.bf16.gmra.mrb[4].mxu0 %v693_v22  ;;  %319 = vmatmul.mubr.bf16.gmra.mrb[4].mxu1 %v694_v23 }
  0x2b   :  { %294 = vmatprep.mubr.bf16.mxu0 %v695_v24  ;;  %326 = vmatprep.mubr.bf16.mxu1 %v697_v25 }
  0x32   :  { %295 = vmatmul.mubr.bf16.gmra.mrb[8].mxu0 %v699_v26  ;;  %327 = vmatmul.mubr.bf16.gmra.mrb[8].mxu1 %v700_v27 }
  0x33   :  { %302 = vmatprep.mubr.bf16.mxu0 %v701_v28  ;;  %334 = vmatprep.mubr.bf16.mxu1 %v703_v29 }
  0x3a   :  { %303 = vmatmul.mubr.bf16.gmra.mrb[12].mxu0 %v705_v30  ;;  %335 = vmatmul.mubr.bf16.gmra.mrb[12].mxu1 %v706_v31 }
  0xf5   :  { %v603_v32 = vpop.f32.mrb[0].mxu0  ;;  %v627_v33 = vpop.f32.mrb[0].mxu1 }
  0xf6   :  { %v604_v35 = vpop.f32.mrb[1].mxu0  ;;  %v628_v36 = vpop.f32.mrb[1].mxu1 }
  0xf7   :  { %v605_v37 = vadd.f32 %v604_v35, %v603_v32  ;;  %v629_v38 = vadd.f32 %v628_v36, %v627_v33  ;;  %v606_v39 = vpop.f32.mrb[2].mxu0  ;;  %v630_v40 = vpop.f32.mrb[2].mxu1 }
  0xf8   :  { %v607_v41 = vpop.f32.mrb[3].mxu0  ;;  %v631_v42 = vpop.f32.mrb[3].mxu1 }
  0xf9   :  { %v281_v43 = vadd.f32 %v605_v37, %v826_v34  ;;  %v313_v44 = vadd.f32 %v629_v38, %v826_v34  ;;  %v608_v45 = vadd.f32 %v607_v41, %v606_v39  ;;  %v632_v46 = vadd.f32 %v631_v42, %v630_v40 }
  0xfb   :  { %v359_v47 = vmul.f32 0.2, %v281_v43  ;;  %v367_v48 = vmul.f32 0.2, %v313_v44  ;;  %vm343_vm0 = vcmp.ge.f32.partialorder %v281_v43, 0.0  ;;  %vm351_vm1 = vcmp.ge.f32.partialorder %v313_v44, 0.0 }
  0xfc   :  { %v284_v49 = vadd.f32 %v608_v45, %v826_v34  ;;  %v316_v50 = vadd.f32 %v632_v46, %v826_v34 }
  0xfd   :  { %v609_v51 = vpop.f32.mrb[4].mxu0  ;;  %v633_v52 = vpop.f32.mrb[4].mxu1  ;;  %v375_v55 = vsel %vm343_vm0, %v281_v43, %v359_v47  ;;  %v383_v56 = vsel %vm351_vm1, %v313_v44, %v367_v48 }
  0xfe   :  { %vm344_vm2 = vcmp.ge.f32.partialorder %v284_v49, 0.0  ;;  %v360_v53 = vmul.f32 0.2, %v284_v49  ;;  %vm352_vm3 = vcmp.ge.f32.partialorder %v316_v50, 0.0  ;;  %v368_v54 = vmul.f32 0.2, %v316_v50 }
  0xff   :  { %v610_v57 = vpop.f32.mrb[5].mxu0  ;;  %v634_v58 = vpop.f32.mrb[5].mxu1 }
 0x100   :  { %v376_v59 = vsel %vm344_vm2, %v284_v49, %v360_v53  ;;  %v384_v60 = vsel %vm352_vm3, %v316_v50, %v368_v54  ;;  %v611_v61 = vadd.f32 %v610_v57, %v609_v51  ;;  %v635_v62 = vadd.f32 %v634_v58, %v633_v52  ;;  %v612_v63 = vpop.f32.mrb[6].mxu0  ;;  %v636_v0 = vpop.f32.mrb[6].mxu1 }
 0x101   :  { %v543_v1 = vpack.c.bf16 %v376_v59, %v375_v55  ;;  %v563_v2 = vpack.c.bf16 %v384_v60, %v383_v56  ;;  %v613_v3 = vpop.f32.mrb[7].mxu0  ;;  %v637_v4 = vpop.f32.mrb[7].mxu1 }
 0x102   :  { %v289_v5 = vadd.f32 %v611_v61, %v826_v34  ;;  %v321_v6 = vadd.f32 %v635_v62, %v826_v34  ;;  %v614_v7 = vadd.f32 %v613_v3, %v612_v63  ;;  %v638_v8 = vadd.f32 %v637_v4, %v636_v0 }
 0x103   :  { %544 = vst [vmem:[%s871_s3] sm:$0xff] %v543_v1   ;;  %583 = vst [vmem:[%s871_s3 + $0x20] sm:$0xff] %v563_v2  }
 0x104   :  { %v361_v9 = vmul.f32 0.2, %v289_v5  ;;  %v369_v10 = vmul.f32 0.2, %v321_v6  ;;  %v292_v11 = vadd.f32 %v614_v7, %v826_v34  ;;  %v324_v12 = vadd.f32 %v638_v8, %v826_v34 }
 0x105   :  { %v615_v13 = vpop.f32.mrb[8].mxu0  ;;  %v639_v14 = vpop.f32.mrb[8].mxu1  ;;  %vm345_vm4 = vcmp.ge.f32.partialorder %v289_v5, 0.0  ;;  %vm353_vm5 = vcmp.ge.f32.partialorder %v321_v6, 0.0 }
 0x106   :  { %v616_v15 = vpop.f32.mrb[9].mxu0  ;;  %v640_v16 = vpop.f32.mrb[9].mxu1  ;;  %vm346_vm6 = vcmp.ge.f32.partialorder %v292_v11, 0.0  ;;  %v362_v17 = vmul.f32 0.2, %v292_v11  ;;  %vm354_vm7 = vcmp.ge.f32.partialorder %v324_v12, 0.0  ;;  %v377_v23 = vsel %vm345_vm4, %v289_v5, %v361_v9 }
 0x107   :  { %v370_v18 = vmul.f32 0.2, %v324_v12  ;;  %v617_v19 = vadd.f32 %v616_v15, %v615_v13  ;;  %v641_v20 = vadd.f32 %v640_v16, %v639_v14  ;;  %v618_v21 = vpop.f32.mrb[10].mxu0  ;;  %v642_v22 = vpop.f32.mrb[10].mxu1  ;;  %v385_v24 = vsel %vm353_vm5, %v321_v6, %v369_v10 }
 0x108   :  { %v378_v25 = vsel %vm346_vm6, %v292_v11, %v362_v17  ;;  %v619_v27 = vpop.f32.mrb[11].mxu0  ;;  %v643_v28 = vpop.f32.mrb[11].mxu1 }
 0x109   :  { %v386_v26 = vsel %vm354_vm7, %v324_v12, %v370_v18  ;;  %v548_v29 = vpack.c.bf16 %v378_v25, %v377_v23  ;;  %v297_v31 = vadd.f32 %v617_v19, %v826_v34  ;;  %v329_v32 = vadd.f32 %v641_v20, %v826_v34 }
 0x10a   :  { %v568_v30 = vpack.c.bf16 %v386_v26, %v385_v24  ;;  %v620_v33 = vadd.f32 %v619_v27, %v618_v21  ;;  %v644_v35 = vadd.f32 %v643_v28, %v642_v22 }
 0x10b   :  { %580 = vst [vmem:[%s871_s3 + $0x8] sm:$0xff] %v548_v29   ;;  %v363_v36 = vmul.f32 0.2, %v297_v31  ;;  %v371_v37 = vmul.f32 0.2, %v329_v32  ;;  %vm347_vm8 = vcmp.ge.f32.partialorder %v297_v31, 0.0 }
 0x10c   :  { %584 = vst [vmem:[%s871_s3 + $0x28] sm:$0xff] %v568_v30   ;;  %v300_v38 = vadd.f32 %v620_v33, %v826_v34  ;;  %v332_v39 = vadd.f32 %v644_v35, %v826_v34  ;;  %vm355_vm9 = vcmp.ge.f32.partialorder %v329_v32, 0.0 }
 0x10d   :  { %v621_v40 = vpop.f32.mrb[12].mxu0  ;;  %v645_v41 = vpop.f32.mrb[12].mxu1  ;;  %v379_v50 = vsel %vm347_vm8, %v297_v31, %v363_v36  ;;  %v387_v51 = vsel %vm355_vm9, %v329_v32, %v371_v37 }
 0x10e   :  { %v622_v42 = vpop.f32.mrb[13].mxu0  ;;  %v646_v43 = vpop.f32.mrb[13].mxu1  ;;  %vm348_vm10 = vcmp.ge.f32.partialorder %v300_v38, 0.0  ;;  %v364_v44 = vmul.f32 0.2, %v300_v38  ;;  %vm356_vm11 = vcmp.ge.f32.partialorder %v332_v39, 0.0 }
 0x10f   :  { %v372_v45 = vmul.f32 0.2, %v332_v39  ;;  %v623_v46 = vadd.f32 %v622_v42, %v621_v40  ;;  %v647_v47 = vadd.f32 %v646_v43, %v645_v41  ;;  %v624_v48 = vpop.f32.mrb[14].mxu0  ;;  %v648_v49 = vpop.f32.mrb[14].mxu1 }
 0x110   :  { %v380_v52 = vsel %vm348_vm10, %v300_v38, %v364_v44  ;;  %v625_v54 = vpop.f32.mrb[15].mxu0  ;;  %v649_v55 = vpop.f32.mrb[15].mxu1 }
 0x111   :  { %v388_v53 = vsel %vm356_vm11, %v332_v39, %v372_v45  ;;  %v553_v56 = vpack.c.bf16 %v380_v52, %v379_v50  ;;  %v305_v58 = vadd.f32 %v623_v46, %v826_v34  ;;  %v337_v59 = vadd.f32 %v647_v47, %v826_v34 }
 0x112   :  { %v573_v57 = vpack.c.bf16 %v388_v53, %v387_v51  ;;  %v626_v60 = vadd.f32 %v625_v54, %v624_v48  ;;  %v650_v61 = vadd.f32 %v649_v55, %v648_v49 }
 0x113   :  { %581 = vst [vmem:[%s871_s3 + $0x10] sm:$0xff] %v553_v56   ;;  %v365_v62 = vmul.f32 0.2, %v305_v58  ;;  %v373_v63 = vmul.f32 0.2, %v337_v59  ;;  %vm349_vm12 = vcmp.ge.f32.partialorder %v305_v58, 0.0 }
 0x114   :  { %585 = vst [vmem:[%s871_s3 + $0x30] sm:$0xff] %v573_v57   ;;  %v308_v0 = vadd.f32 %v626_v60, %v826_v34  ;;  %v340_v1 = vadd.f32 %v650_v61, %v826_v34  ;;  %vm357_vm13 = vcmp.ge.f32.partialorder %v337_v59, 0.0 }
 0x115   :  { %v381_v4 = vsel %vm349_vm12, %v305_v58, %v365_v62  ;;  %v389_v5 = vsel %vm357_vm13, %v337_v59, %v373_v63 }
 0x116   :  { %vm350_vm14 = vcmp.ge.f32.partialorder %v308_v0, 0.0  ;;  %v366_v2 = vmul.f32 0.2, %v308_v0  ;;  %vm358_vm15 = vcmp.ge.f32.partialorder %v340_v1, 0.0  ;;  %v374_v3 = vmul.f32 0.2, %v340_v1 }
 0x118   :  { %v382_v6 = vsel %vm350_vm14, %v308_v0, %v366_v2  ;;  %v390_v7 = vsel %vm358_vm15, %v340_v1, %v374_v3 }
 0x119   :  { %v558_v8 = vpack.c.bf16 %v382_v6, %v381_v4  ;;  %v578_v9 = vpack.c.bf16 %v390_v7, %v389_v5 }
 0x11b   :  { %582 = vst [vmem:[%s871_s3 + $0x18] sm:$0xff] %v558_v8   ;;  %586 = vst [vmem:[%s871_s3 + $0x38] sm:$0xff] %v578_v9  }

// kernel: forward.8
= control target key start
LH: loop header
LB: loop body
LE: loop exit
PB: predicated region body
PF: predicated region fallthrough
CT: control target
= control target key end

     0   :  { %s769_s1 = inlined_call_operand.vmem [shape: bf16[512,128], index: 1, kind: input, shape index: {}]   ;;  %s770_s0 = inlined_call_operand.vmem [shape: bf16[32,512], index: 0, kind: input, shape index: {}]   ;;  %s771_s2 = inlined_call_operand.vmem [shape: f32[1,128], index: 2, kind: input, shape index: {}]   ;;  %s772_s3 = inlined_call_operand.vmem [shape: bf16[32,128], index: 3, kind: output, shape index: {}]  }
   0x1   :  { %v576_v0 = vld [vmem:[%s769_s1 + $0x40] sm:$0xff]   ;;  %v580_v4 = vld [vmem:[%s769_s1 + $0x48] sm:$0xff]   ;;  %v584_v8 = vld [vmem:[%s769_s1 + $0x50] sm:$0xff]  }
   0x2   :  { %v577_v1 = vld [vmem:[%s769_s1 + $0xc0] sm:$0xff]   ;;  %520 = vmatprep.subr.bf16.mxu0 %v576_v0  ;;  %v581_v5 = vld [vmem:[%s769_s1 + $0xc8] sm:$0xff]   ;;  %v585_v9 = vld [vmem:[%s769_s1 + $0xd0] sm:$0xff]  }
   0x3   :  { %v578_v2 = vld [vmem:[%s769_s1] sm:$0xff]   ;;  %548 = vmatprep.subr.bf16.mxu1 %v577_v1  ;;  %v582_v6 = vld [vmem:[%s769_s1 + $0x8] sm:$0xff]   ;;  %v586_v10 = vld [vmem:[%s769_s1 + $0x10] sm:$0xff]  }
   0x4   :  { %v579_v3 = vld [vmem:[%s769_s1 + $0x80] sm:$0xff]   ;;  %521 = vmatpush3.bf16.msra.mxu0 %v578_v2  ;;  %v583_v7 = vld [vmem:[%s769_s1 + $0x88] sm:$0xff]   ;;  %v587_v11 = vld [vmem:[%s769_s1 + $0x90] sm:$0xff]  }
   0x5   :  { %549 = vmatpush3.bf16.msra.mxu1 %v579_v3  ;;  %522 = vmatprep.subr.bf16.mxu0 %v580_v4  ;;  %v588_v12 = vld [vmem:[%s769_s1 + $0x58] sm:$0xff]   ;;  %v592_v16 = vld [vmem:[%s769_s1 + $0x60] sm:$0xff]   ;;  %v596_v20 = vld [vmem:[%s769_s1 + $0x68] sm:$0xff]  }
   0x6   :  { %550 = vmatprep.subr.bf16.mxu1 %v581_v5  ;;  %v589_v13 = vld [vmem:[%s769_s1 + $0xd8] sm:$0xff]   ;;  %v593_v17 = vld [vmem:[%s769_s1 + $0xe0] sm:$0xff]   ;;  %v597_v21 = vld [vmem:[%s769_s1 + $0xe8] sm:$0xff]  }
   0x7   :  { %v590_v14 = vld [vmem:[%s769_s1 + $0x18] sm:$0xff]   ;;  %v594_v18 = vld [vmem:[%s769_s1 + $0x20] sm:$0xff]   ;;  %v598_v22 = vld [vmem:[%s769_s1 + $0x28] sm:$0xff]  }
   0x8   :  { %523 = vmatpush3.bf16.msra.mxu0 %v582_v6  ;;  %v591_v15 = vld [vmem:[%s769_s1 + $0x98] sm:$0xff]   ;;  %v595_v19 = vld [vmem:[%s769_s1 + $0xa0] sm:$0xff]   ;;  %v599_v23 = vld [vmem:[%s769_s1 + $0xa8] sm:$0xff]  }
   0x9   :  { %551 = vmatpush3.bf16.msra.mxu1 %v583_v7  ;;  %524 = vmatprep.subr.bf16.mxu0 %v584_v8  ;;  %v600_v24 = vld [vmem:[%s769_s1 + $0x70] sm:$0xff]   ;;  %v604_v28 = vld [vmem:[%s769_s1 + $0x78] sm:$0xff]   ;;  %v460_v42 = vld [vmem:[%s771_s2] ss:$0 sm:$0xff] }
   0xa   :  { %552 = vmatprep.subr.bf16.mxu1 %v585_v9  ;;  %v601_v25 = vld [vmem:[%s769_s1 + $0xf0] sm:$0xff]   ;;  %v605_v29 = vld [vmem:[%s769_s1 + $0xf8] sm:$0xff]  }
   0xb   :  { %v602_v26 = vld [vmem:[%s769_s1 + $0x30] sm:$0xff]   ;;  %v606_v30 = vld [vmem:[%s769_s1 + $0x38] sm:$0xff]  }
   0xc   :  { %525 = vmatpush3.bf16.msra.mxu0 %v586_v10  ;;  %v603_v27 = vld [vmem:[%s769_s1 + $0xb0] sm:$0xff]   ;;  %v607_v31 = vld [vmem:[%s769_s1 + $0xb8] sm:$0xff]  }
   0xd   :  { %553 = vmatpush3.bf16.msra.mxu1 %v587_v11  ;;  %526 = vmatprep.subr.bf16.mxu0 %v588_v12  ;;  %v608_v32 = vld [vmem:[%s770_s0] ss:$16 sps:$4 sm:$0xff]   ;;  %v610_v33 = vld [vmem:[%s770_s0 + $0x4] ss:$16 sps:$4 sm:$0xff]   ;;  %v611_v34 = vld [vmem:[%s770_s0 + $0x8] ss:$16 sps:$4 sm:$0xff]  }
   0xe   :  { %554 = vmatprep.subr.bf16.mxu1 %v589_v13  ;;  %v613_v35 = vld [vmem:[%s770_s0 + $0xc] ss:$16 sps:$4 sm:$0xff]   ;;  %358 = vmatprep.mubr.bf16.mxu0 %v610_v33  ;;  %v614_v36 = vld [vmem:[%s770_s0 + $0x24] ss:$16 sps:$4 sm:$0xff]   ;;  %v618_v38 = vld [vmem:[%s770_s0 + $0x20] ss:$16 sps:$4 sm:$0xff]  }
   0xf   :  { %407 = vmatprep.mubr.bf16.mxu1 %v613_v35  ;;  %v616_v37 = vld [vmem:[%s770_s0 + $0x2c] ss:$16 sps:$4 sm:$0xff]   ;;  %v619_v39 = vld [vmem:[%s770_s0 + $0x28] ss:$16 sps:$4 sm:$0xff]  }
  0x10   :  { %527 = vmatpush3.bf16.msra.mxu0 %v590_v14 }
  0x11   :  { %555 = vmatpush3.bf16.msra.mxu1 %v591_v15  ;;  %528 = vmatprep.subr.bf16.mxu0 %v592_v16 }
  0x12   :  { %556 = vmatprep.subr.bf16.mxu1 %v593_v17 }
  0x14   :  { %529 = vmatpush3.bf16.msra.mxu0 %v594_v18 }
  0x15   :  { %557 = vmatpush3.bf16.msra.mxu1 %v595_v19  ;;  %530 = vmatprep.subr.bf16.mxu0 %v596_v20 }
  0x16   :  { %558 = vmatprep.subr.bf16.mxu1 %v597_v21 }
  0x18   :  { %531 = vmatpush3.bf16.msra.mxu0 %v598_v22 }
  0x19   :  { %559 = vmatpush3.bf16.msra.mxu1 %v599_v23  ;;  %532 = vmatprep.subr.bf16.mxu0 %v600_v24 }
  0x1a   :  { %560 = vmatprep.subr.bf16.mxu1 %v601_v25 }
  0x1c   :  { %533 = vmatpush3.bf16.msra.mxu0 %v602_v26 }
  0x1d   :  { %561 = vmatpush3.bf16.msra.mxu1 %v603_v27  ;;  %534 = vmatprep.subr.bf16.mxu0 %v604_v28 }
  0x1e   :  { %562 = vmatprep.subr.bf16.mxu1 %v605_v29 }
  0x20   :  { %535 = vmatpush3.bf16.msra.mxu0 %v606_v30 }
  0x21   :  { %563 = vmatpush3.bf16.msra.mxu1 %v607_v31 }
  0x23   :  { %359 = vmatmul.mubr.bf16.vlgmr.msra.gmra.mrb[0].mxu0 %v608_v32 }
  0x24   :  { %408 = vmatmul.mubr.bf16.vlgmr.msra.gmra.mrb[0].mxu1 %v611_v34  ;;  %366 = vmatprep.mubr.bf16.mxu0 %v614_v36 }
  0x25   :  { %415 = vmatprep.mubr.bf16.mxu1 %v616_v37 }
  0x2b   :  { %367 = vmatmul.mubr.bf16.gmra.mrb[4].mxu0 %v618_v38 }
  0x2c   :  { %416 = vmatmul.mubr.bf16.gmra.mrb[4].mxu1 %v619_v39 }
  0xf6   :  { %v536_v40 = vpop.f32.mrb[0].mxu0 }
  0xf7   :  { %v564_v41 = vpop.f32.mrb[0].mxu1  ;;  %v537_v43 = vpop.f32.mrb[1].mxu0 }
  0xf8   :  { %v538_v44 = vadd.f32 %v537_v43, %v536_v40  ;;  %v565_v45 = vpop.f32.mrb[1].mxu1  ;;  %v539_v46 = vpop.f32.mrb[2].mxu0 }
  0xf9   :  { %v566_v47 = vadd.f32 %v565_v45, %v564_v41  ;;  %v567_v48 = vpop.f32.mrb[2].mxu1  ;;  %v540_v49 = vpop.f32.mrb[3].mxu0 }
  0xfa   :  { %v361_v50 = vadd.f32 %v538_v44, %v460_v42  ;;  %v541_v51 = vadd.f32 %v540_v49, %v539_v46  ;;  %v568_v52 = vpop.f32.mrb[3].mxu1 }
  0xfb   :  { %v569_v53 = vadd.f32 %v568_v52, %v567_v48 }
  0xfc   :  { %v410_v54 = vadd.f32 %v566_v47, %v361_v50  ;;  %v364_v55 = vadd.f32 %v541_v51, %v460_v42 }
  0xfe   :  { %v428_v56 = vmul.f32 0.2, %v410_v54  ;;  %v413_v57 = vadd.f32 %v569_v53, %v364_v55  ;;  %v542_v58 = vpop.f32.mrb[4].mxu0  ;;  %vm424_vm0 = vcmp.ge.f32.partialorder %v410_v54, 0.0 }
  0xff   :  { %v570_v59 = vpop.f32.mrb[4].mxu1  ;;  %v543_v60 = vpop.f32.mrb[5].mxu0 }
 0x100   :  { %vm425_vm1 = vcmp.ge.f32.partialorder %v413_v57, 0.0  ;;  %v429_v61 = vmul.f32 0.2, %v413_v57  ;;  %v544_v62 = vadd.f32 %v543_v60, %v542_v58  ;;  %v571_v63 = vpop.f32.mrb[5].mxu1  ;;  %v545_v0 = vpop.f32.mrb[6].mxu0  ;;  %v432_v4 = vsel %vm424_vm0, %v410_v54, %v428_v56 }
 0x101   :  { %v572_v1 = vadd.f32 %v571_v63, %v570_v59  ;;  %v573_v2 = vpop.f32.mrb[6].mxu1  ;;  %v546_v3 = vpop.f32.mrb[7].mxu0 }
 0x102   :  { %v433_v5 = vsel %vm425_vm1, %v413_v57, %v429_v61  ;;  %v369_v6 = vadd.f32 %v544_v62, %v460_v42  ;;  %v547_v7 = vadd.f32 %v546_v3, %v545_v0  ;;  %v574_v8 = vpop.f32.mrb[7].mxu1 }
 0x103   :  { %v512_v9 = vpack.c.bf16 %v433_v5, %v432_v4  ;;  %v575_v10 = vadd.f32 %v574_v8, %v573_v2 }
 0x104   :  { %v418_v11 = vadd.f32 %v572_v1, %v369_v6  ;;  %v372_v12 = vadd.f32 %v547_v7, %v460_v42 }
 0x105   :  { %513 = vst [vmem:[%s772_s3] sm:$0xff] %v512_v9  }
 0x106   :  { %v430_v13 = vmul.f32 0.2, %v418_v11  ;;  %v421_v14 = vadd.f32 %v575_v10, %v372_v12  ;;  %vm426_vm2 = vcmp.ge.f32.partialorder %v418_v11, 0.0 }
 0x108   :  { %vm427_vm3 = vcmp.ge.f32.partialorder %v421_v14, 0.0  ;;  %v431_v15 = vmul.f32 0.2, %v421_v14  ;;  %v434_v16 = vsel %vm426_vm2, %v418_v11, %v430_v13 }
 0x10a   :  { %v435_v17 = vsel %vm427_vm3, %v421_v14, %v431_v15 }
 0x10b   :  { %v517_v18 = vpack.c.bf16 %v435_v17, %v434_v16 }
 0x10d   :  { %519 = vst [vmem:[%s772_s3 + $0x8] sm:$0xff] %v517_v18  }

// kernel: forward.9
= control target key start
LH: loop header
LB: loop body
LE: loop exit
PB: predicated region body
PF: predicated region fallthrough
CT: control target
= control target key end

     0   :  { %s1175_s1 = inlined_call_operand.vmem [shape: bf16[1024,128], index: 1, kind: input, shape index: {}]   ;;  %s1176_s0 = inlined_call_operand.vmem [shape: bf16[8,1024], index: 0, kind: input, shape index: {}]   ;;  %s1177_s2 = inlined_call_operand.vmem [shape: f32[8,128], index: 2, kind: output, shape index: {}]  }
   0x1   :  { %v881_v0 = vld [vmem:[%s1175_s1 + $0x40] sm:$0xff]   ;;  %v885_v4 = vld [vmem:[%s1175_s1 + $0x48] sm:$0xff]   ;;  %v889_v8 = vld [vmem:[%s1175_s1 + $0x50] sm:$0xff]  }
   0x2   :  { %v882_v1 = vld [vmem:[%s1175_s1 + $0xc0] sm:$0xff]   ;;  %793 = vmatprep.subr.bf16.mxu0 %v881_v0  ;;  %v886_v5 = vld [vmem:[%s1175_s1 + $0xc8] sm:$0xff]   ;;  %v890_v9 = vld [vmem:[%s1175_s1 + $0xd0] sm:$0xff]  }
   0x3   :  { %v883_v2 = vld [vmem:[%s1175_s1] sm:$0xff]   ;;  %815 = vmatprep.subr.bf16.mxu1 %v882_v1  ;;  %v887_v6 = vld [vmem:[%s1175_s1 + $0x8] sm:$0xff]   ;;  %v891_v10 = vld [vmem:[%s1175_s1 + $0x10] sm:$0xff]  }
   0x4   :  { %v884_v3 = vld [vmem:[%s1175_s1 + $0x80] sm:$0xff]   ;;  %794 = vmatpush3.bf16.msra.mxu0 %v883_v2  ;;  %v888_v7 = vld [vmem:[%s1175_s1 + $0x88] sm:$0xff]   ;;  %v892_v11 = vld [vmem:[%s1175_s1 + $0x90] sm:$0xff]  }
   0x5   :  { %816 = vmatpush3.bf16.msra.mxu1 %v884_v3  ;;  %795 = vmatprep.subr.bf16.mxu0 %v885_v4  ;;  %v893_v12 = vld [vmem:[%s1175_s1 + $0x58] sm:$0xff]   ;;  %v897_v16 = vld [vmem:[%s1175_s1 + $0x60] sm:$0xff]   ;;  %v901_v20 = vld [vmem:[%s1175_s1 + $0x68] sm:$0xff]  }
   0x6   :  { %817 = vmatprep.subr.bf16.mxu1 %v886_v5  ;;  %v894_v13 = vld [vmem:[%s1175_s1 + $0xd8] sm:$0xff]   ;;  %v898_v17 = vld [vmem:[%s1175_s1 + $0xe0] sm:$0xff]   ;;  %v902_v21 = vld [vmem:[%s1175_s1 + $0xe8] sm:$0xff]  }
   0x7   :  { %v895_v14 = vld [vmem:[%s1175_s1 + $0x18] sm:$0xff]   ;;  %v899_v18 = vld [vmem:[%s1175_s1 + $0x20] sm:$0xff]   ;;  %v903_v22 = vld [vmem:[%s1175_s1 + $0x28] sm:$0xff]  }
   0x8   :  { %796 = vmatpush3.bf16.msra.mxu0 %v887_v6  ;;  %v896_v15 = vld [vmem:[%s1175_s1 + $0x98] sm:$0xff]   ;;  %v900_v19 = vld [vmem:[%s1175_s1 + $0xa0] sm:$0xff]   ;;  %v904_v23 = vld [vmem:[%s1175_s1 + $0xa8] sm:$0xff]  }
   0x9   :  { %818 = vmatpush3.bf16.msra.mxu1 %v888_v7  ;;  %797 = vmatprep.subr.bf16.mxu0 %v889_v8  ;;  %v905_v24 = vld [vmem:[%s1175_s1 + $0x70] sm:$0xff]   ;;  %v909_v28 = vld [vmem:[%s1175_s1 + $0x78] sm:$0xff]   ;;  %v12_v32 = vld [vmem:[%s1176_s0] sm:$0xff] }
   0xa   :  { %819 = vmatprep.subr.bf16.mxu1 %v890_v9  ;;  %v906_v25 = vld [vmem:[%s1175_s1 + $0xf0] sm:$0xff]   ;;  %v910_v29 = vld [vmem:[%s1175_s1 + $0xf8] sm:$0xff]   ;;  %v13_v33 = vld [vmem:[%s1176_s0 + $0x8] sm:$0xff]  ;;  %v721_v34 = vcombine.low %v12_v32, %v12_v32  ;;  %v722_v35 = vcombine.high %v12_v32, %v12_v32 }
   0xb   :  { %v907_v26 = vld [vmem:[%s1175_s1 + $0x30] sm:$0xff]   ;;  %v911_v30 = vld [vmem:[%s1175_s1 + $0x38] sm:$0xff]   ;;  %v723_v36 = vcombine.low %v13_v33, %v13_v33  ;;  %v724_v37 = vcombine.high %v13_v33, %v13_v33  ;;  %v917_v38 = vld [vmem:[%s1175_s1 + $0x140] sm:$0xff]  }
   0xc   :  { %798 = vmatpush3.bf16.msra.mxu0 %v891_v10  ;;  %v908_v27 = vld [vmem:[%s1175_s1 + $0xb0] sm:$0xff]   ;;  %v912_v31 = vld [vmem:[%s1175_s1 + $0xb8] sm:$0xff]   ;;  %v918_v39 = vld [vmem:[%s1175_s1 + $0x1c0] sm:$0xff]   ;;  %588 = vmatprep.mubr.bf16.mxu0 %v722_v35 }
   0xd   :  { %820 = vmatpush3.bf16.msra.mxu1 %v892_v11  ;;  %799 = vmatprep.subr.bf16.mxu0 %v893_v12  ;;  %v919_v40 = vld [vmem:[%s1175_s1 + $0x100] sm:$0xff]   ;;  %v921_v42 = vld [vmem:[%s1175_s1 + $0x148] sm:$0xff]   ;;  %v925_v46 = vld [vmem:[%s1175_s1 + $0x150] sm:$0xff]  }
   0xe   :  { %821 = vmatprep.subr.bf16.mxu1 %v894_v13  ;;  %628 = vmatprep.mubr.bf16.mxu1 %v724_v37  ;;  %v920_v41 = vld [vmem:[%s1175_s1 + $0x180] sm:$0xff]   ;;  %v922_v43 = vld [vmem:[%s1175_s1 + $0x1c8] sm:$0xff]   ;;  %v926_v47 = vld [vmem:[%s1175_s1 + $0x1d0] sm:$0xff]  }
   0xf   :  { %v923_v44 = vld [vmem:[%s1175_s1 + $0x108] sm:$0xff]   ;;  %v927_v48 = vld [vmem:[%s1175_s1 + $0x110] sm:$0xff]   ;;  %v929_v50 = vld [vmem:[%s1175_s1 + $0x158] sm:$0xff]  }
  0x10   :  { %800 = vmatpush3.bf16.msra.mxu0 %v895_v14  ;;  %v924_v45 = vld [vmem:[%s1175_s1 + $0x188] sm:$0xff]   ;;  %v928_v49 = vld [vmem:[%s1175_s1 + $0x190] sm:$0xff]   ;;  %v930_v51 = vld [vmem:[%s1175_s1 + $0x1d8] sm:$0xff]  }
  0x11   :  { %822 = vmatpush3.bf16.msra.mxu1 %v896_v15  ;;  %801 = vmatprep.subr.bf16.mxu0 %v897_v16  ;;  %v931_v52 = vld [vmem:[%s1175_s1 + $0x118] sm:$0xff]   ;;  %v933_v54 = vld [vmem:[%s1175_s1 + $0x160] sm:$0xff]   ;;  %v937_v58 = vld [vmem:[%s1175_s1 + $0x168] sm:$0xff]  }
  0x12   :  { %823 = vmatprep.subr.bf16.mxu1 %v898_v17  ;;  %v932_v53 = vld [vmem:[%s1175_s1 + $0x198] sm:$0xff]   ;;  %v934_v55 = vld [vmem:[%s1175_s1 + $0x1e0] sm:$0xff]   ;;  %v938_v59 = vld [vmem:[%s1175_s1 + $0x1e8] sm:$0xff]  }
  0x13   :  { %v935_v56 = vld [vmem:[%s1175_s1 + $0x120] sm:$0xff]   ;;  %v939_v60 = vld [vmem:[%s1175_s1 + $0x128] sm:$0xff]   ;;  %v941_v62 = vld [vmem:[%s1175_s1 + $0x170] sm:$0xff]  }
  0x14   :  { %802 = vmatpush3.bf16.msra.mxu0 %v899_v18  ;;  %v936_v57 = vld [vmem:[%s1175_s1 + $0x1a0] sm:$0xff]   ;;  %v940_v61 = vld [vmem:[%s1175_s1 + $0x1a8] sm:$0xff]   ;;  %v942_v63 = vld [vmem:[%s1175_s1 + $0x1f0] sm:$0xff]  }
  0x15   :  { %824 = vmatpush3.bf16.msra.mxu1 %v900_v19  ;;  %803 = vmatprep.subr.bf16.mxu0 %v901_v20  ;;  %v943_v0 = vld [vmem:[%s1175_s1 + $0x130] sm:$0xff]   ;;  %v945_v2 = vld [vmem:[%s1175_s1 + $0x178] sm:$0xff]  }
  0x16   :  { %825 = vmatprep.subr.bf16.mxu1 %v902_v21  ;;  %v944_v1 = vld [vmem:[%s1175_s1 + $0x1b0] sm:$0xff]   ;;  %v946_v3 = vld [vmem:[%s1175_s1 + $0x1f8] sm:$0xff]  }
  0x17   :  { %v947_v4 = vld [vmem:[%s1175_s1 + $0x138] sm:$0xff]   ;;  %v14_v6 = vld [vmem:[%s1176_s0 + $0x10] sm:$0xff] }
  0x18   :  { %804 = vmatpush3.bf16.msra.mxu0 %v903_v22  ;;  %v948_v5 = vld [vmem:[%s1175_s1 + $0x1b8] sm:$0xff]   ;;  %v725_v7 = vcombine.low %v14_v6, %v14_v6  ;;  %v726_v8 = vcombine.high %v14_v6, %v14_v6 }
  0x19   :  { %826 = vmatpush3.bf16.msra.mxu1 %v904_v23  ;;  %805 = vmatprep.subr.bf16.mxu0 %v905_v24  ;;  %v15_v9 = vld [vmem:[%s1176_s0 + $0x18] sm:$0xff] }
  0x1a   :  { %827 = vmatprep.subr.bf16.mxu1 %v906_v25  ;;  %v727_v10 = vcombine.low %v15_v9, %v15_v9  ;;  %v728_v11 = vcombine.high %v15_v9, %v15_v9 }
  0x1c   :  { %806 = vmatpush3.bf16.msra.mxu0 %v907_v26 }
  0x1d   :  { %828 = vmatpush3.bf16.msra.mxu1 %v908_v27  ;;  %807 = vmatprep.subr.bf16.mxu0 %v909_v28 }
  0x1e   :  { %829 = vmatprep.subr.bf16.mxu1 %v910_v29 }
  0x20   :  { %808 = vmatpush3.bf16.msra.mxu0 %v911_v30 }
  0x21   :  { %830 = vmatpush3.bf16.msra.mxu1 %v912_v31  ;;  %837 = vmatprep.subr.bf16.mxu0 %v917_v38 }
  0x22   :  { %859 = vmatprep.subr.bf16.mxu1 %v918_v39 }
  0x23   :  { %589 = vmatmul.mubr.bf16.vlgmr.msra.gmra.mrb[0].mxu0 %v721_v34 }
  0x24   :  { %629 = vmatmul.mubr.bf16.vlgmr.msra.gmra.mrb[0].mxu1 %v723_v36  ;;  %838 = vmatpush3.bf16.msra.mxu0 %v919_v40 }
  0x25   :  { %860 = vmatpush3.bf16.msra.mxu1 %v920_v41  ;;  %839 = vmatprep.subr.bf16.mxu0 %v921_v42 }
  0x26   :  { %861 = vmatprep.subr.bf16.mxu1 %v922_v43  ;;  %668 = vmatprep.mubr.bf16.mxu0 %v726_v8 }
  0x27   :  { %708 = vmatprep.mubr.bf16.mxu1 %v728_v11 }
  0x28   :  { %840 = vmatpush3.bf16.msra.mxu0 %v923_v44 }
  0x29   :  { %862 = vmatpush3.bf16.msra.mxu1 %v924_v45  ;;  %841 = vmatprep.subr.bf16.mxu0 %v925_v46 }
  0x2a   :  { %863 = vmatprep.subr.bf16.mxu1 %v926_v47 }
  0x2c   :  { %842 = vmatpush3.bf16.msra.mxu0 %v927_v48 }
  0x2d   :  { %864 = vmatpush3.bf16.msra.mxu1 %v928_v49  ;;  %843 = vmatprep.subr.bf16.mxu0 %v929_v50 }
  0x2e   :  { %865 = vmatprep.subr.bf16.mxu1 %v930_v51 }
  0x30   :  { %844 = vmatpush3.bf16.msra.mxu0 %v931_v52 }
  0x31   :  { %866 = vmatpush3.bf16.msra.mxu1 %v932_v53  ;;  %845 = vmatprep.subr.bf16.mxu0 %v933_v54 }
  0x32   :  { %867 = vmatprep.subr.bf16.mxu1 %v934_v55 }
  0x34   :  { %846 = vmatpush3.bf16.msra.mxu0 %v935_v56 }
  0x35   :  { %868 = vmatpush3.bf16.msra.mxu1 %v936_v57  ;;  %847 = vmatprep.subr.bf16.mxu0 %v937_v58 }
  0x36   :  { %869 = vmatprep.subr.bf16.mxu1 %v938_v59 }
  0x38   :  { %848 = vmatpush3.bf16.msra.mxu0 %v939_v60 }
  0x39   :  { %870 = vmatpush3.bf16.msra.mxu1 %v940_v61  ;;  %849 = vmatprep.subr.bf16.mxu0 %v941_v62 }
  0x3a   :  { %871 = vmatprep.subr.bf16.mxu1 %v942_v63 }
  0x3c   :  { %850 = vmatpush3.bf16.msra.mxu0 %v943_v0 }
  0x3d   :  { %872 = vmatpush3.bf16.msra.mxu1 %v944_v1  ;;  %851 = vmatprep.subr.bf16.mxu0 %v945_v2 }
  0x3e   :  { %873 = vmatprep.subr.bf16.mxu1 %v946_v3 }
  0x40   :  { %852 = vmatpush3.bf16.msra.mxu0 %v947_v4 }
  0x41   :  { %874 = vmatpush3.bf16.msra.mxu1 %v948_v5 }
  0x43   :  { %669 = vmatmul.mubr.bf16.vlgmr.msra.gmra.mrb[4].mxu0 %v725_v7 }
  0x44   :  { %709 = vmatmul.mubr.bf16.vlgmr.msra.gmra.mrb[4].mxu1 %v727_v10 }
  0xf6   :  { %v809_v12 = vpop.f32.mrb[0].mxu0 }
  0xf7   :  { %v831_v13 = vpop.f32.mrb[0].mxu1  ;;  %v810_v14 = vpop.f32.mrb[1].mxu0 }
  0xf8   :  { %v832_v15 = vpop.f32.mrb[1].mxu1  ;;  %v811_v16 = vadd.f32 %v810_v14, %v809_v12  ;;  %v812_v18 = vpop.f32.mrb[2].mxu0 }
  0xf9   :  { %v833_v17 = vadd.f32 %v832_v15, %v831_v13  ;;  %v834_v19 = vpop.f32.mrb[2].mxu1  ;;  %v813_v20 = vpop.f32.mrb[3].mxu0 }
  0xfa   :  { %v835_v21 = vpop.f32.mrb[3].mxu1 }
  0xfb   :  { %v631_v22 = vadd.f32 %v833_v17, %v811_v16 }
 0x116   :  { %v853_v23 = vpop.f32.mrb[4].mxu0 }
 0x117   :  { %v875_v24 = vpop.f32.mrb[4].mxu1  ;;  %v854_v25 = vpop.f32.mrb[5].mxu0 }
 0x118   :  { %v876_v26 = vpop.f32.mrb[5].mxu1  ;;  %v855_v27 = vadd.f32 %v854_v25, %v853_v23  ;;  %v856_v29 = vpop.f32.mrb[6].mxu0 }
 0x119   :  { %v877_v28 = vadd.f32 %v876_v26, %v875_v24  ;;  %v878_v30 = vpop.f32.mrb[6].mxu1  ;;  %v857_v31 = vpop.f32.mrb[7].mxu0 }
 0x11a   :  { %v879_v32 = vpop.f32.mrb[7].mxu1  ;;  %v671_v33 = vadd.f32 %v855_v27, %v631_v22 }
 0x11c   :  { %v711_v34 = vadd.f32 %v877_v28, %v671_v33 }
 0x11e   :  { %716 = vst [vmem:[%s1177_s2] sm:$0xff] %v711_v34 }

</bundles_post_ra>
